<compile_context>
chip_gen: v7x
topology: tpu7x:2x2x1
jax: 0.10.0
libtpu: 0.0.40
codegen_flags: <defaults>
</compile_context>

<pallas_src>
import math

import jax
import jax.numpy as jnp
from jax.experimental import pallas as pl
from jax.experimental.pallas import tpu as pltpu


def _round_up(n, m):
    return ((n + m - 1) // m) * m


def _mlp_kernel(x_ref, w1_ref, b1_ref, w2_ref, b2_ref, w3_ref, b3_ref, out_ref):
    # Cast the streamed f32 activations to bf16 in-kernel (VPU work hidden
    # under the MXU) instead of materializing a padded bf16 copy in HBM.
    x = x_ref[...].astype(w1_ref.dtype)
    # Layer 1: Linear + ReLU (bf16 MXU inputs, f32 accumulate, f32 bias/ReLU)
    h1 = jnp.dot(x, w1_ref[...], preferred_element_type=jnp.float32)
    h1 = jnp.maximum(h1 + b1_ref[...], 0.0)
    # Layer 2: Linear + ReLU
    h2 = jnp.dot(h1.astype(w2_ref.dtype), w2_ref[...],
                 preferred_element_type=jnp.float32)
    h2 = jnp.maximum(h2 + b2_ref[...], 0.0)
    # Output layer: Linear, 10 logits (full last dim; tiny masked store)
    logits = jnp.dot(h2.astype(w3_ref.dtype), w3_ref[...],
                     preferred_element_type=jnp.float32)
    out_ref[...] = (logits + b3_ref[...]).astype(out_ref.dtype)
    # TODO(synk): dropout (p=0.5) path omitted since the module defaults to
    # dropout=False; would use pltpu.prng_seed + pltpu.prng_random_bits if needed.


def init_params(key, input_size=784, hidden_sizes=(512, 256), n_classes=10):
    """Kaiming-uniform-like init matching nn.Linear defaults.
    Weights stored already transposed to (in, out); biases as (1, out)."""
    sizes = [input_size] + list(hidden_sizes) + [n_classes]
    params = {}
    for i in range(len(sizes) - 1):
        fan_in, fan_out = sizes[i], sizes[i + 1]
        key, kw, kb = jax.random.split(key, 3)
        bound_w = math.sqrt(1.0 / fan_in) * math.sqrt(3.0)  # kaiming_uniform(a=sqrt(5))
        bound_b = 1.0 / math.sqrt(fan_in)
        params[f"w{i+1}"] = jax.random.uniform(
            kw, (fan_in, fan_out), jnp.float32, -bound_w, bound_w)
        params[f"b{i+1}"] = jax.random.uniform(
            kb, (1, fan_out), jnp.float32, -bound_b, bound_b)
    return params


def prepare_params(params, compute_dtype=jnp.bfloat16):
    """Cast weights to the MXU compute dtype (bf16 — valid on v5e/v6e/v7x; do
    NOT swap to int8, v7x's MXU has no integer path).  Biases stay f32.
    No K/N padding is needed anymore (kernel reads K=784, writes N=10)."""
    out = {}
    for i in (1, 2, 3):
        out[f"w{i}"] = params[f"w{i}"].astype(compute_dtype)
        out[f"b{i}"] = params[f"b{i}"].astype(jnp.float32)
    return out


def _call(x2d, prepped, tb, grid, cost, single_buffer_weights):
    B, K = x2d.shape
    H1 = prepped["w1"].shape[1]
    H2 = prepped["w2"].shape[1]
    N = prepped["w3"].shape[1]

    if single_buffer_weights:
        # Constant index_map => fetched once; one buffer is enough.
        def resident(shape):
            return pl.BlockSpec(shape, lambda i: (0, 0),
                                pipeline_mode=pl.Buffered(1))
    else:
        def resident(shape):
            return pl.BlockSpec(shape, lambda i: (0, 0))

    return pl.pallas_call(
        _mlp_kernel,
        out_shape=jax.ShapeDtypeStruct((B, N), jnp.float32),
        grid=grid,
        in_specs=[
            pl.BlockSpec((tb, K), lambda i: (i, 0)),   # x: streamed f32 tiles
            resident((K, H1)), resident((1, H1)),      # weights/biases: resident
            resident((H1, H2)), resident((1, H2)),
            resident((H2, N)), resident((1, N)),
        ],
        out_specs=pl.BlockSpec((tb, N), lambda i: (i, 0)),
        compiler_params=pltpu.CompilerParams(
            dimension_semantics=("parallel",),
            vmem_limit_bytes=32 * 1024 * 1024,
        ),
        cost_estimate=cost,
    )(x2d, prepped["w1"], prepped["b1"], prepped["w2"], prepped["b2"],
      prepped["w3"], prepped["b3"])


def mlp_forward(x, prepped, *, input_size=784, block_b=1024):
    """x: any shape reshapable to (-1, input_size), f32. prepped: prepare_params output."""
    x2d = x.reshape(-1, input_size)          # stays f32; kernel casts in VMEM
    B = x2d.shape[0]

    K, H1 = prepped["w1"].shape
    H2 = prepped["w2"].shape[1]
    N = prepped["w3"].shape[1]

    # Balanced batch tiling: >=2 grid steps when B allows (second TensorCore on
    # v7x + prefetch/compute overlap), near-equal tile sizes (no mostly-padded
    # trailing tile), tb a multiple of 8 sublanes and <= block_b.
    min_steps = 2 if B >= 16 else 1
    n_steps = max(min_steps, pl.cdiv(B, block_b))
    tb = _round_up(pl.cdiv(B, n_steps), 8)
    grid = (pl.cdiv(B, tb),)

    weight_bytes = sum(int(v.size) * v.dtype.itemsize for v in prepped.values())
    cost = pl.CostEstimate(
        flops=2 * B * (K * H1 + H1 * H2 + H2 * N),
        transcendentals=0,
        bytes_accessed=B * K * 4 + B * N * 4 + weight_bytes,
    )

    try:
        return _call(x2d, prepped, tb, grid, cost, single_buffer_weights=True)
    except Exception:
        # Fallback for JAX builds without BlockSpec(pipeline_mode=...):
        # default double-buffered weights (~1 MiB extra VMEM, otherwise identical).
        return _call(x2d, prepped, tb, grid, cost, single_buffer_weights=False)


def _reference_forward(x, params, input_size=784, compute_dtype=jnp.bfloat16):
    """Pure-JAX reference with the same bf16-input / f32-accumulate numerics."""
    x2d = x.reshape(-1, input_size).astype(compute_dtype)
    w1 = params["w1"].astype(compute_dtype)
    w2 = params["w2"].astype(compute_dtype)
    w3 = params["w3"].astype(compute_dtype)
    h1 = jnp.maximum(
        jnp.dot(x2d, w1, preferred_element_type=jnp.float32) + params["b1"], 0.0)
    h2 = jnp.maximum(
        jnp.dot(h1.astype(compute_dtype), w2,
                preferred_element_type=jnp.float32) + params["b2"], 0.0)
    return jnp.dot(h2.astype(compute_dtype), w3,
                   preferred_element_type=jnp.float32) + params["b3"]


if __name__ == "__main__":
    key = jax.random.PRNGKey(0)
    key_x, key_x2, key_p = jax.random.split(key, 3)

    params = init_params(key_p)
    prepped = prepare_params(params)

    # MNIST-like input: (batch, 1, 28, 28) -> view(-1, 784) inside forward.
    x = jax.random.normal(key_x, (2, 1, 28, 28), dtype=jnp.float32)
    logits = jax.block_until_ready(mlp_forward(x, prepped))
    assert logits.shape == (2, 10)
    ref = _reference_forward(x, params)
    assert jnp.allclose(logits, ref, atol=2e-3, rtol=2e-3)

    # Second check: batch not divisible by the tile size — exercises the
    # multi-step balanced grid (2 tiles of 304 rows) and masked trailing rows.
    x2 = jax.random.normal(key_x2, (600, 784), dtype=jnp.float32)
    logits2 = jax.block_until_ready(mlp_forward(x2, prepped))
    assert logits2.shape == (600, 10)
    ref2 = _reference_forward(x2, params)
    assert jnp.allclose(logits2, ref2, atol=2e-3, rtol=2e-3)

    print("KERNEL_OK")
</pallas_src>

<mosaic_0001>
module attributes {stable_mosaic.version = 11 : i64} {
  func.func @_mlp_kernel(%arg0: i32, %arg1: memref<8x784xf32, #tpu.memory_space<vmem>>, %arg2: memref<784x512xbf16, #tpu.memory_space<vmem>>, %arg3: memref<1x512xf32, #tpu.memory_space<vmem>>, %arg4: memref<512x256xbf16, #tpu.memory_space<vmem>>, %arg5: memref<1x256xf32, #tpu.memory_space<vmem>>, %arg6: memref<256x10xbf16, #tpu.memory_space<vmem>>, %arg7: memref<1x10xf32, #tpu.memory_space<vmem>>, %arg8: memref<8x10xf32, #tpu.memory_space<vmem>>) attributes {dimension_semantics = [#tpu.dimension_semantics<parallel>], iteration_bounds = array<i64: 1>, scalar_prefetch = 0 : i64, scratch_operands = 0 : i64, tpu.core_type = #tpu.core_type<tc>, window_params = [{transform_indices = @transform_0, window_bounds = array<i64: 8, 784>}, {pipeline_mode = #tpu.pipeline_mode<synchronous>, transform_indices = @transform_1, window_bounds = array<i64: 784, 512>}, {pipeline_mode = #tpu.pipeline_mode<synchronous>, transform_indices = @transform_2, window_bounds = array<i64: 1, 512>}, {pipeline_mode = #tpu.pipeline_mode<synchronous>, transform_indices = @transform_3, window_bounds = array<i64: 512, 256>}, {pipeline_mode = #tpu.pipeline_mode<synchronous>, transform_indices = @transform_4, window_bounds = array<i64: 1, 256>}, {pipeline_mode = #tpu.pipeline_mode<synchronous>, transform_indices = @transform_5, window_bounds = array<i64: 256, 10>}, {pipeline_mode = #tpu.pipeline_mode<synchronous>, transform_indices = @transform_6, window_bounds = array<i64: 1, 10>}, {transform_indices = @transform_7, window_bounds = array<i64: 8, 10>}]} {
    %c0 = arith.constant 0 : index
    %c0_0 = arith.constant 0 : index
    %0 = vector.load %arg1[%c0, %c0_0] : memref<8x784xf32, #tpu.memory_space<vmem>>, vector<8x784xf32>
    %1 = arith.truncf %0 : vector<8x784xf32> to vector<8x784xbf16>
    %c0_1 = arith.constant 0 : index
    %c0_2 = arith.constant 0 : index
    %2 = vector.load %arg2[%c0_1, %c0_2] : memref<784x512xbf16, #tpu.memory_space<vmem>>, vector<784x512xbf16>
    %cst = arith.constant dense<0.000000e+00> : vector<8x512xf32>
    %3 = tpu.matmul %1, %2, %cst {dimension_numbers = #tpu.dot_dimension_numbers<[1], [0], [0], [1], [0, 0, 1, 1], [], []>} : vector<8x784xbf16>, vector<784x512xbf16>, vector<8x512xf32> -> vector<8x512xf32>
    %c0_3 = arith.constant 0 : index
    %c0_4 = arith.constant 0 : index
    %4 = vector.load %arg3[%c0_3, %c0_4] : memref<1x512xf32, #tpu.memory_space<vmem>>, vector<1x512xf32>
    %5 = vector.broadcast %4 : vector<1x512xf32> to vector<8x512xf32>
    %6 = arith.addf %3, %5 : vector<8x512xf32>
    %cst_5 = arith.constant 0.000000e+00 : f32
    %7 = vector.broadcast %cst_5 : f32 to vector<8x512xf32>
    %8 = arith.maximumf %6, %7 : vector<8x512xf32>
    %9 = arith.truncf %8 : vector<8x512xf32> to vector<8x512xbf16>
    %c0_6 = arith.constant 0 : index
    %c0_7 = arith.constant 0 : index
    %10 = vector.load %arg4[%c0_6, %c0_7] : memref<512x256xbf16, #tpu.memory_space<vmem>>, vector<512x256xbf16>
    %cst_8 = arith.constant dense<0.000000e+00> : vector<8x256xf32>
    %11 = tpu.matmul %9, %10, %cst_8 {dimension_numbers = #tpu.dot_dimension_numbers<[1], [0], [0], [1], [0, 0, 1, 1], [], []>} : vector<8x512xbf16>, vector<512x256xbf16>, vector<8x256xf32> -> vector<8x256xf32>
    %c0_9 = arith.constant 0 : index
    %c0_10 = arith.constant 0 : index
    %12 = vector.load %arg5[%c0_9, %c0_10] : memref<1x256xf32, #tpu.memory_space<vmem>>, vector<1x256xf32>
    %13 = vector.broadcast %12 : vector<1x256xf32> to vector<8x256xf32>
    %14 = arith.addf %11, %13 : vector<8x256xf32>
    %cst_11 = arith.constant 0.000000e+00 : f32
    %15 = vector.broadcast %cst_11 : f32 to vector<8x256xf32>
    %16 = arith.maximumf %14, %15 : vector<8x256xf32>
    %17 = arith.truncf %16 : vector<8x256xf32> to vector<8x256xbf16>
    %c0_12 = arith.constant 0 : index
    %c0_13 = arith.constant 0 : index
    %18 = vector.load %arg6[%c0_12, %c0_13] : memref<256x10xbf16, #tpu.memory_space<vmem>>, vector<256x10xbf16>
    %cst_14 = arith.constant dense<0.000000e+00> : vector<8x10xf32>
    %19 = tpu.matmul %17, %18, %cst_14 {dimension_numbers = #tpu.dot_dimension_numbers<[1], [0], [0], [1], [0, 0, 1, 1], [], []>} : vector<8x256xbf16>, vector<256x10xbf16>, vector<8x10xf32> -> vector<8x10xf32>
    %c0_15 = arith.constant 0 : index
    %c0_16 = arith.constant 0 : index
    %20 = vector.load %arg7[%c0_15, %c0_16] : memref<1x10xf32, #tpu.memory_space<vmem>>, vector<1x10xf32>
    %21 = vector.broadcast %20 : vector<1x10xf32> to vector<8x10xf32>
    %22 = arith.addf %19, %21 : vector<8x10xf32>
    %c0_17 = arith.constant 0 : index
    %c0_18 = arith.constant 0 : index
    %23 = vector.load %arg8[%c0_17, %c0_18] : memref<8x10xf32, #tpu.memory_space<vmem>>, vector<8x10xf32>
    tpu.vector_store %arg8[%c0_17, %c0_18], %22 {strides = array<i32>} : memref<8x10xf32, #tpu.memory_space<vmem>>, vector<8x10xf32>,
    return
  }
  func.func @transform_0(%arg0: i32) -> (i32, i32) {
    %c0_i32 = arith.constant 0 : i32
    %c0_i32_0 = arith.constant 0 : i32
    return %arg0, %c0_i32 : i32, i32
  }
  func.func @transform_1(%arg0: i32) -> (i32, i32) {
    %c0_i32 = arith.constant 0 : i32
    %c0_i32_0 = arith.constant 0 : i32
    %c0_i32_1 = arith.constant 0 : i32
    return %c0_i32, %c0_i32_0 : i32, i32
  }
  func.func @transform_2(%arg0: i32) -> (i32, i32) {
    %c0_i32 = arith.constant 0 : i32
    %c0_i32_0 = arith.constant 0 : i32
    %c0_i32_1 = arith.constant 0 : i32
    return %c0_i32, %c0_i32_0 : i32, i32
  }
  func.func @transform_3(%arg0: i32) -> (i32, i32) {
    %c0_i32 = arith.constant 0 : i32
    %c0_i32_0 = arith.constant 0 : i32
    %c0_i32_1 = arith.constant 0 : i32
    return %c0_i32, %c0_i32_0 : i32, i32
  }
  func.func @transform_4(%arg0: i32) -> (i32, i32) {
    %c0_i32 = arith.constant 0 : i32
    %c0_i32_0 = arith.constant 0 : i32
    %c0_i32_1 = arith.constant 0 : i32
    return %c0_i32, %c0_i32_0 : i32, i32
  }
  func.func @transform_5(%arg0: i32) -> (i32, i32) {
    %c0_i32 = arith.constant 0 : i32
    %c0_i32_0 = arith.constant 0 : i32
    %c0_i32_1 = arith.constant 0 : i32
    return %c0_i32, %c0_i32_0 : i32, i32
  }
  func.func @transform_6(%arg0: i32) -> (i32, i32) {
    %c0_i32 = arith.constant 0 : i32
    %c0_i32_0 = arith.constant 0 : i32
    %c0_i32_1 = arith.constant 0 : i32
    return %c0_i32, %c0_i32_0 : i32, i32
  }
  func.func @transform_7(%arg0: i32) -> (i32, i32) {
    %c0_i32 = arith.constant 0 : i32
    %c0_i32_0 = arith.constant 0 : i32
    return %arg0, %c0_i32 : i32, i32
  }
}

module attributes {stable_mosaic.version = 11 : i64} {
  func.func @_mlp_kernel(%arg0: i32, %arg1: memref<8x784xf32, #tpu.memory_space<vmem>>, %arg2: memref<784x512xbf16, #tpu.memory_space<vmem>>, %arg3: memref<1x512xf32, #tpu.memory_space<vmem>>, %arg4: memref<512x256xbf16, #tpu.memory_space<vmem>>, %arg5: memref<1x256xf32, #tpu.memory_space<vmem>>, %arg6: memref<256x10xbf16, #tpu.memory_space<vmem>>, %arg7: memref<1x10xf32, #tpu.memory_space<vmem>>, %arg8: memref<8x10xf32, #tpu.memory_space<vmem>>) attributes {dimension_semantics = [#tpu.dimension_semantics<parallel>], iteration_bounds = array<i64: 1>, scalar_prefetch = 0 : i64, scratch_operands = 0 : i64, tpu.core_type = #tpu.core_type<tc>, window_params = [{transform_indices = @transform_0, window_bounds = array<i64: 8, 784>}, {pipeline_mode = #tpu.pipeline_mode<synchronous>, transform_indices = @transform_1, window_bounds = array<i64: 784, 512>}, {pipeline_mode = #tpu.pipeline_mode<synchronous>, transform_indices = @transform_2, window_bounds = array<i64: 1, 512>}, {pipeline_mode = #tpu.pipeline_mode<synchronous>, transform_indices = @transform_3, window_bounds = array<i64: 512, 256>}, {pipeline_mode = #tpu.pipeline_mode<synchronous>, transform_indices = @transform_4, window_bounds = array<i64: 1, 256>}, {pipeline_mode = #tpu.pipeline_mode<synchronous>, transform_indices = @transform_5, window_bounds = array<i64: 256, 10>}, {pipeline_mode = #tpu.pipeline_mode<synchronous>, transform_indices = @transform_6, window_bounds = array<i64: 1, 10>}, {transform_indices = @transform_7, window_bounds = array<i64: 8, 10>}]} {
    %c0 = arith.constant 0 : index
    %c0_0 = arith.constant 0 : index
    %0 = vector.load %arg1[%c0, %c0_0] : memref<8x784xf32, #tpu.memory_space<vmem>>, vector<8x784xf32>
    %1 = arith.truncf %0 : vector<8x784xf32> to vector<8x784xbf16>
    %c0_1 = arith.constant 0 : index
    %c0_2 = arith.constant 0 : index
    %2 = vector.load %arg2[%c0_1, %c0_2] : memref<784x512xbf16, #tpu.memory_space<vmem>>, vector<784x512xbf16>
    %cst = arith.constant dense<0.000000e+00> : vector<8x512xf32>
    %3 = tpu.matmul %1, %2, %cst {dimension_numbers = #tpu.dot_dimension_numbers<[1], [0], [0], [1], [0, 0, 1, 1], [], []>} : vector<8x784xbf16>, vector<784x512xbf16>, vector<8x512xf32> -> vector<8x512xf32>
    %c0_3 = arith.constant 0 : index
    %c0_4 = arith.constant 0 : index
    %4 = vector.load %arg3[%c0_3, %c0_4] : memref<1x512xf32, #tpu.memory_space<vmem>>, vector<1x512xf32>
    %5 = vector.broadcast %4 : vector<1x512xf32> to vector<8x512xf32>
    %6 = arith.addf %3, %5 : vector<8x512xf32>
    %cst_5 = arith.constant 0.000000e+00 : f32
    %7 = vector.broadcast %cst_5 : f32 to vector<8x512xf32>
    %8 = arith.maximumf %6, %7 : vector<8x512xf32>
    %9 = arith.truncf %8 : vector<8x512xf32> to vector<8x512xbf16>
    %c0_6 = arith.constant 0 : index
    %c0_7 = arith.constant 0 : index
    %10 = vector.load %arg4[%c0_6, %c0_7] : memref<512x256xbf16, #tpu.memory_space<vmem>>, vector<512x256xbf16>
    %cst_8 = arith.constant dense<0.000000e+00> : vector<8x256xf32>
    %11 = tpu.matmul %9, %10, %cst_8 {dimension_numbers = #tpu.dot_dimension_numbers<[1], [0], [0], [1], [0, 0, 1, 1], [], []>} : vector<8x512xbf16>, vector<512x256xbf16>, vector<8x256xf32> -> vector<8x256xf32>
    %c0_9 = arith.constant 0 : index
    %c0_10 = arith.constant 0 : index
    %12 = vector.load %arg5[%c0_9, %c0_10] : memref<1x256xf32, #tpu.memory_space<vmem>>, vector<1x256xf32>
    %13 = vector.broadcast %12 : vector<1x256xf32> to vector<8x256xf32>
    %14 = arith.addf %11, %13 : vector<8x256xf32>
    %cst_11 = arith.constant 0.000000e+00 : f32
    %15 = vector.broadcast %cst_11 : f32 to vector<8x256xf32>
    %16 = arith.maximumf %14, %15 : vector<8x256xf32>
    %17 = arith.truncf %16 : vector<8x256xf32> to vector<8x256xbf16>
    %c0_12 = arith.constant 0 : index
    %c0_13 = arith.constant 0 : index
    %18 = vector.load %arg6[%c0_12, %c0_13] : memref<256x10xbf16, #tpu.memory_space<vmem>>, vector<256x10xbf16>
    %cst_14 = arith.constant dense<0.000000e+00> : vector<8x10xf32>
    %19 = tpu.matmul %17, %18, %cst_14 {dimension_numbers = #tpu.dot_dimension_numbers<[1], [0], [0], [1], [0, 0, 1, 1], [], []>} : vector<8x256xbf16>, vector<256x10xbf16>, vector<8x10xf32> -> vector<8x10xf32>
    %c0_15 = arith.constant 0 : index
    %c0_16 = arith.constant 0 : index
    %20 = vector.load %arg7[%c0_15, %c0_16] : memref<1x10xf32, #tpu.memory_space<vmem>>, vector<1x10xf32>
    %21 = vector.broadcast %20 : vector<1x10xf32> to vector<8x10xf32>
    %22 = arith.addf %19, %21 : vector<8x10xf32>
    %c0_17 = arith.constant 0 : index
    %c0_18 = arith.constant 0 : index
    %23 = vector.load %arg8[%c0_17, %c0_18] : memref<8x10xf32, #tpu.memory_space<vmem>>, vector<8x10xf32>
    tpu.vector_store %arg8[%c0_17, %c0_18], %22 {strides = array<i32>} : memref<8x10xf32, #tpu.memory_space<vmem>>, vector<8x10xf32>,
    return
  }
  func.func @transform_0(%arg0: i32) -> (i32, i32) {
    %c0_i32 = arith.constant 0 : i32
    %c0_i32_0 = arith.constant 0 : i32
    return %arg0, %c0_i32 : i32, i32
  }
  func.func @transform_1(%arg0: i32) -> (i32, i32) {
    %c0_i32 = arith.constant 0 : i32
    %c0_i32_0 = arith.constant 0 : i32
    %c0_i32_1 = arith.constant 0 : i32
    return %c0_i32, %c0_i32_0 : i32, i32
  }
  func.func @transform_2(%arg0: i32) -> (i32, i32) {
    %c0_i32 = arith.constant 0 : i32
    %c0_i32_0 = arith.constant 0 : i32
    %c0_i32_1 = arith.constant 0 : i32
    return %c0_i32, %c0_i32_0 : i32, i32
  }
  func.func @transform_3(%arg0: i32) -> (i32, i32) {
    %c0_i32 = arith.constant 0 : i32
    %c0_i32_0 = arith.constant 0 : i32
    %c0_i32_1 = arith.constant 0 : i32
    return %c0_i32, %c0_i32_0 : i32, i32
  }
  func.func @transform_4(%arg0: i32) -> (i32, i32) {
    %c0_i32 = arith.constant 0 : i32
    %c0_i32_0 = arith.constant 0 : i32
    %c0_i32_1 = arith.constant 0 : i32
    return %c0_i32, %c0_i32_0 : i32, i32
  }
  func.func @transform_5(%arg0: i32) -> (i32, i32) {
    %c0_i32 = arith.constant 0 : i32
    %c0_i32_0 = arith.constant 0 : i32
    %c0_i32_1 = arith.constant 0 : i32
    return %c0_i32, %c0_i32_0 : i32, i32
  }
  func.func @transform_6(%arg0: i32) -> (i32, i32) {
    %c0_i32 = arith.constant 0 : i32
    %c0_i32_0 = arith.constant 0 : i32
    %c0_i32_1 = arith.constant 0 : i32
    return %c0_i32, %c0_i32_0 : i32, i32
  }
  func.func @transform_7(%arg0: i32) -> (i32, i32) {
    %c0_i32 = arith.constant 0 : i32
    %c0_i32_0 = arith.constant 0 : i32
    return %arg0, %c0_i32 : i32, i32
  }
}

</mosaic_0001>

<bundles_post_ra>
// kernel: tpu_custom_call.1
= control target key start
LH: loop header
LB: loop body
LE: loop exit
PB: predicated region body
PF: predicated region fallthrough
CT: control target
= control target key end

     0   :  { %12 = vsyncpa [#allocation3], 0  ;;  %s3437_s0 = inlined_call_operand.vmem [shape: f32[2,784], index: 0, kind: input, shape index: {}]   ;;  %s3438_s1 = inlined_call_operand.hbm [shape: bf16[784,512], index: 1, kind: input, shape index: {}]   ;;  %s3439_s2 = inlined_call_operand.vmem [shape: f32[1,512], index: 2, kind: input, shape index: {}]   ;;  %s3440_s3 = inlined_call_operand.hbm [shape: bf16[512,256], index: 3, kind: input, shape index: {}]   ;;  %s3441_s4 = inlined_call_operand.vmem [shape: f32[1,256], index: 4, kind: input, shape index: {}]   ;;  %s3442_s5 = inlined_call_operand.vmem [shape: bf16[256,10], index: 5, kind: input, shape index: {}]   ;;  %s3443_s6 = inlined_call_operand.vmem [shape: f32[1,10], index: 6, kind: input, shape index: {}]   ;;  %s3444_s7 = inlined_call_operand.hbm [shape: f32[2,10], index: 7, kind: output, shape index: {}]  }
   0x1   :  { %13 = vsyncpa [#allocation6], 0 }
   0x2   :  { %14 = vsyncpa [#allocation4], 0  ;;  %s3204_s24 = smov [#allocation2]   ;;  %s3132_s28 = scalar_lea.hbm %s3438_s1, 25088 }
   0x3   :  { %s22_s25 = sshll.u32 %s3204_s24, 4  ;;  %p3133_p0 = scmp.ne.s32.totalorder %s3438_s1, %s3132_s28  ;;  %s23_s25 = int_to_ptr.vmem [resolvable:$true] %s22_s25 }
   0x4   :  { %p3136_p1 = scmp.lt.u32.totalorder %s3132_s28, %s3438_s1 }
   0x6   :  { %p3138_p2 = pnand %p3136_p1, %p3133_p0 }
   0x8   :  { %3141 = shalt.err (!%p3138_p2)
}
   0x9   :  { %s3142_s10 = scalar_lea.vmem %s23_s25, 25088  ;;  %p3147_p4 = scmp.lt.s32.totalorder %s23_s25, %s23_s25 }
   0xa   :  { %p3143_p3 = scmp.ne.s32.totalorder %s23_s25, %s3142_s10  ;;  %p3148_p5 = scmp.lt.s32.totalorder %s3142_s10, %s3142_s10 }
   0xc   :  { %p3149_p6 = por %p3148_p5, %p3147_p4 }
   0xe   :  { %p3150_p7 = pnand %p3149_p6, %p3143_p3 }
  0x10   :  { %3153 = shalt.err (!%p3150_p7)
}
  0x11   :  { %s3205_s11 = smov 256   ;;  %s3206_s12 = smov 16  }
  0x12   :  { %28 = dma.hbm_to_vmem [thread:$0]  %s3438_s1, 25088, %s23_s25, [#allocation3], %s3205_s11, %s3205_s11, %s3206_s12  }
  0x13   :  { %s3207_s15 = smov [#allocation5]   ;;  %s3154_s19 = scalar_lea.hbm %s3440_s3, 8192 }
  0x14   :  { %s36_s16 = sshll.u32 %s3207_s15, 4  ;;  %p3155_p8 = scmp.ne.s32.totalorder %s3440_s3, %s3154_s19  ;;  %s37_s16 = int_to_ptr.vmem [resolvable:$true] %s36_s16 }
  0x15   :  { %p3158_p9 = scmp.lt.u32.totalorder %s3154_s19, %s3440_s3 }
  0x17   :  { %p3160_p10 = pnand %p3158_p9, %p3155_p8 }
  0x19   :  { %3163 = shalt.err (!%p3160_p10)
}
  0x1a   :  { %s3164_s24 = scalar_lea.vmem %s37_s16, 8192  ;;  %p3169_p12 = scmp.lt.s32.totalorder %s37_s16, %s37_s16 }
  0x1b   :  { %p3165_p11 = scmp.ne.s32.totalorder %s37_s16, %s3164_s24  ;;  %p3170_p13 = scmp.lt.s32.totalorder %s3164_s24, %s3164_s24 }
  0x1d   :  { %p3171_p0 = por %p3170_p13, %p3169_p12 }
  0x1f   :  { %p3172_p1 = pnand %p3171_p0, %p3165_p11 }
  0x21   :  { %3175 = shalt.err (!%p3172_p1)
}
  0x22   :  { %s3208_s1 = smov 128   ;;  %s3209_s25 = smov 8  }
  0x23   :  { %42 = dma.hbm_to_vmem [thread:$0]  %s3440_s3, 8192, %s37_s16, [#allocation6], %s3208_s1, %s3208_s1, %s3209_s25  }
  0x24   :  { %3198 = dma.done.wait [#allocation3], 25088  }
  0x25   :  { %3199 = vsyncadd [#allocation3], 4294942208 }
  0x26   :  { %3200 = dma.done.wait [#allocation6], 8192  }
  0x27   :  { %3201 = vsyncadd [#allocation6], 4294959104  ;;  %v2714_v0 = vld [vmem:[#allocation2 + $0x4] ss:$16 sps:$4 sm:$0xff]   ;;  %v2718_v2 = vld [vmem:[#allocation2] ss:$16 sps:$4 sm:$0xff]   ;;  %v79_v40 = vlaneseq }
  0x28   :  { %v2716_v1 = vld [vmem:[#allocation2 + $0x204] ss:$16 sps:$4 sm:$0xff]   ;;  %1359 = vmatprep.subr.bf16.mxu1 %v2714_v0  ;;  %v2719_v3 = vld [vmem:[#allocation2 + $0x200] ss:$16 sps:$4 sm:$0xff]   ;;  %v3210_v38 = vmov 1983009808  }
  0x29   :  { %1400 = vmatprep.subr.bf16.mxu0 %v2716_v1  ;;  %v2720_v4 = vld [vmem:[#allocation2 + $0x24] ss:$16 sps:$4 sm:$0xff]   ;;  %1360 = vmatpush1.bf16.msra.mxu1 %v2718_v2  ;;  %v2724_v6 = vld [vmem:[#allocation2 + $0x20] ss:$16 sps:$4 sm:$0xff]   ;;  %v77_v39 = vunpack.c.l.s4 %v3210_v38  ;;  %v3279_v46 = vshrl.u32 %v79_v40, 7  ;;  %vm1355_vm0 = vcmask 130048  }
  0x2a   :  { %1401 = vmatpush1.bf16.msra.mxu0 %v2719_v3  ;;  %v2722_v5 = vld [vmem:[#allocation2 + $0x224] ss:$16 sps:$4 sm:$0xff]   ;;  %1361 = vmatprep.subr.bf16.mxu1 %v2720_v4  ;;  %v2725_v7 = vld [vmem:[#allocation2 + $0x220] ss:$16 sps:$4 sm:$0xff]   ;;  %v2812_v57 = vld [vmem:[%s3437_s0 + $0x1c] ss:$14 sps:$4 sm:$0xff]  }
  0x2b   :  { %1402 = vmatprep.subr.bf16.mxu0 %v2722_v5  ;;  %v2726_v8 = vld [vmem:[#allocation2 + $0x44] ss:$16 sps:$4 sm:$0xff]   ;;  %v2730_v10 = vld [vmem:[#allocation2 + $0x40] ss:$16 sps:$4 sm:$0xff]   ;;  %v78_v45 = vunpack.c.0.s8 %v77_v39  ;;  %v2845_v39 = vld [vmem:[#allocation2 + $0x8c] ss:$16 sps:$4 sm:$0xff]  }
  0x2c   :  { %v2728_v9 = vld [vmem:[#allocation2 + $0x244] ss:$16 sps:$4 sm:$0xff]   ;;  %v2731_v11 = vld [vmem:[#allocation2 + $0x240] ss:$16 sps:$4 sm:$0xff]   ;;  %vm2352_vm1 = vcmask 80896  }
  0x2d   :  { %1362 = vmatpush1.bf16.msra.mxu1 %v2724_v6  ;;  %v2732_v12 = vld [vmem:[#allocation2 + $0x64] ss:$16 sps:$4 sm:$0xff]   ;;  %v2736_v14 = vld [vmem:[#allocation2 + $0x60] ss:$16 sps:$4 sm:$0xff]   ;;  %v3282_v53 = vsub.s32 %v78_v45, %v3279_v46  ;;  %v2849_v45 = vld [vmem:[#allocation2 + $0xa8] ss:$16 sps:$4 sm:$0xff]  }
  0x2e   :  { %1403 = vmatpush1.bf16.msra.mxu0 %v2725_v7  ;;  %1363 = vmatprep.subr.bf16.mxu1 %v2726_v8  ;;  %v2734_v13 = vld [vmem:[#allocation2 + $0x264] ss:$16 sps:$4 sm:$0xff]   ;;  %v2737_v15 = vld [vmem:[#allocation2 + $0x260] ss:$16 sps:$4 sm:$0xff]  }
  0x2f   :  { %1404 = vmatprep.subr.bf16.mxu0 %v2728_v9  ;;  %v2738_v16 = vld [vmem:[#allocation2 + $0x84] ss:$16 sps:$4 sm:$0xff]   ;;  %v2742_v18 = vld [vmem:[#allocation2 + $0x80] ss:$16 sps:$4 sm:$0xff]   ;;  %v96_v61 = vrot.slane %v2812_v57, %v3282_v53 }
  0x30   :  { %v2740_v17 = vld [vmem:[#allocation2 + $0x284] ss:$16 sps:$4 sm:$0xff]   ;;  %v2743_v19 = vld [vmem:[#allocation2 + $0x280] ss:$16 sps:$4 sm:$0xff]  }
  0x31   :  { %1364 = vmatpush1.bf16.msra.mxu1 %v2730_v10  ;;  %v2744_v20 = vld [vmem:[#allocation2 + $0xa4] ss:$16 sps:$4 sm:$0xff]   ;;  %v2748_v22 = vld [vmem:[#allocation2 + $0xa0] ss:$16 sps:$4 sm:$0xff]  }
  0x32   :  { %1405 = vmatpush1.bf16.msra.mxu0 %v2731_v11  ;;  %1365 = vmatprep.subr.bf16.mxu1 %v2732_v12  ;;  %v2746_v21 = vld [vmem:[#allocation2 + $0x2a4] ss:$16 sps:$4 sm:$0xff]   ;;  %v2749_v23 = vld [vmem:[#allocation2 + $0x2a0] ss:$16 sps:$4 sm:$0xff]  }
  0x33   :  { %1406 = vmatprep.subr.bf16.mxu0 %v2734_v13  ;;  %v2750_v24 = vld [vmem:[#allocation2 + $0xc4] ss:$16 sps:$4 sm:$0xff]   ;;  %v2754_v26 = vld [vmem:[#allocation2 + $0xc0] ss:$16 sps:$4 sm:$0xff]  }
  0x34   :  { %v2752_v25 = vld [vmem:[#allocation2 + $0x2c4] ss:$16 sps:$4 sm:$0xff]   ;;  %v2755_v27 = vld [vmem:[#allocation2 + $0x2c0] ss:$16 sps:$4 sm:$0xff]  }
  0x35   :  { %1366 = vmatpush1.bf16.msra.mxu1 %v2736_v14  ;;  %v2756_v28 = vld [vmem:[#allocation2 + $0xe4] ss:$16 sps:$4 sm:$0xff]   ;;  %v2760_v30 = vld [vmem:[#allocation2 + $0xe0] ss:$16 sps:$4 sm:$0xff]  }
  0x36   :  { %1407 = vmatpush1.bf16.msra.mxu0 %v2737_v15  ;;  %1367 = vmatprep.subr.bf16.mxu1 %v2738_v16  ;;  %v2758_v29 = vld [vmem:[#allocation2 + $0x2e4] ss:$16 sps:$4 sm:$0xff]   ;;  %v2761_v31 = vld [vmem:[#allocation2 + $0x2e0] ss:$16 sps:$4 sm:$0xff]  }
  0x37   :  { %1408 = vmatprep.subr.bf16.mxu0 %v2740_v17  ;;  %v2762_v32 = vld [vmem:[#allocation2 + $0x104] ss:$16 sps:$4 sm:$0xff]   ;;  %v2766_v34 = vld [vmem:[#allocation2 + $0x100] ss:$16 sps:$4 sm:$0xff]  }
  0x38   :  { %v2764_v33 = vld [vmem:[#allocation2 + $0x304] ss:$16 sps:$4 sm:$0xff]   ;;  %v2767_v35 = vld [vmem:[#allocation2 + $0x300] ss:$16 sps:$4 sm:$0xff]  }
  0x39   :  { %1368 = vmatpush1.bf16.msra.mxu1 %v2742_v18  ;;  %v2768_v36 = vld [vmem:[#allocation2 + $0x124] ss:$16 sps:$4 sm:$0xff]   ;;  %v2772_v41 = vld [vmem:[#allocation2 + $0x120] ss:$16 sps:$4 sm:$0xff]  }
  0x3a   :  { %1409 = vmatpush1.bf16.msra.mxu0 %v2743_v19  ;;  %1369 = vmatprep.subr.bf16.mxu1 %v2744_v20  ;;  %v2770_v37 = vld [vmem:[#allocation2 + $0x324] ss:$16 sps:$4 sm:$0xff]   ;;  %v2773_v42 = vld [vmem:[#allocation2 + $0x320] ss:$16 sps:$4 sm:$0xff]  }
  0x3b   :  { %1410 = vmatprep.subr.bf16.mxu0 %v2746_v21  ;;  %v2774_v43 = vld [vmem:[#allocation2 + $0x144] ss:$16 sps:$4 sm:$0xff]   ;;  %v2778_v47 = vld [vmem:[#allocation2 + $0x140] ss:$16 sps:$4 sm:$0xff]   ;;  %v2821_v21 = vld [vmem:[#allocation2 + $0xc] ss:$16 sps:$4 sm:$0xff]  }
  0x3c   :  { %v2776_v44 = vld [vmem:[#allocation2 + $0x344] ss:$16 sps:$4 sm:$0xff]   ;;  %v2779_v48 = vld [vmem:[#allocation2 + $0x340] ss:$16 sps:$4 sm:$0xff]  }
  0x3d   :  { %1370 = vmatpush1.bf16.msra.mxu1 %v2748_v22  ;;  %v2780_v49 = vld [vmem:[#allocation2 + $0x164] ss:$16 sps:$4 sm:$0xff]   ;;  %v2784_v51 = vld [vmem:[#allocation2 + $0x160] ss:$16 sps:$4 sm:$0xff]  }
  0x3e   :  { %1411 = vmatpush1.bf16.msra.mxu0 %v2749_v23  ;;  %1371 = vmatprep.subr.bf16.mxu1 %v2750_v24  ;;  %v2782_v50 = vld [vmem:[#allocation2 + $0x364] ss:$16 sps:$4 sm:$0xff]   ;;  %v2785_v52 = vld [vmem:[#allocation2 + $0x360] ss:$16 sps:$4 sm:$0xff]   ;;  %v2819_v24 = vld [vmem:[#allocation2 + $0x8] ss:$16 sps:$4 sm:$0xff]  }
  0x3f   :  { %1412 = vmatprep.subr.bf16.mxu0 %v2752_v25  ;;  %v2786_v54 = vld [vmem:[#allocation2 + $0x184] ss:$16 sps:$4 sm:$0xff]   ;;  %v2810_v56 = vld [vmem:[%s3437_s0] ss:$14 sps:$4 sm:$0xff]  }
  0x40   :  { %v2788_v55 = vld [vmem:[#allocation2 + $0x384] ss:$16 sps:$4 sm:$0xff]   ;;  %v2815_v59 = vld [vmem:[%s3437_s0 + $0x20] ss:$14 sps:$4 sm:$0xff]   ;;  %v82_v60 = vrot.slane %v2810_v56, %v3282_v53 }
  0x41   :  { %1372 = vmatpush1.bf16.msra.mxu1 %v2754_v26  ;;  %v2814_v58 = vld [vmem:[%s3437_s0 + $0x4] ss:$14 sps:$4 sm:$0xff]   ;;  %v103_v1 = vrot.slane %v2815_v59, %v3282_v53  ;;  %v2861_v59 = vld [vmem:[#allocation2 + $0xe8] ss:$16 sps:$4 sm:$0xff]  }
  0x42   :  { %1413 = vmatpush1.bf16.msra.mxu0 %v2755_v27  ;;  %1373 = vmatprep.subr.bf16.mxu1 %v2756_v28  ;;  %v89_v62 = vrot.slane %v2814_v58, %v3282_v53  ;;  %v2790_v63 = vld [vmem:[#allocation2 + $0x180] ss:$16 sps:$4 sm:$0xff]   ;;  %v2792_v2 = vld [vmem:[#allocation2 + $0x1a4] ss:$16 sps:$4 sm:$0xff]   ;;  %v105_v3 = vcombine.high %v82_v60, %v96_v61  ;;  %v104_v18 = vcombine.low %v82_v60, %v96_v61  ;;  %v2827_v27 = vld [vmem:[#allocation2 + $0x2c] ss:$16 sps:$4 sm:$0xff]  }
  0x43   :  { %1414 = vmatprep.subr.bf16.mxu0 %v2758_v29  ;;  %v2791_v0 = vld [vmem:[#allocation2 + $0x380] ss:$16 sps:$4 sm:$0xff]   ;;  %v2794_v4 = vld [vmem:[#allocation2 + $0x3a4] ss:$16 sps:$4 sm:$0xff]   ;;  %v2825_v29 = vld [vmem:[#allocation2 + $0x28] ss:$16 sps:$4 sm:$0xff]  }
  0x44   :  { %v107_v5 = vcombine.high %v89_v62, %v103_v1  ;;  %v151_v6 = vpack.c.bf16 %v105_v3, %v105_v3  ;;  %v2796_v7 = vld [vmem:[#allocation2 + $0x1a0] ss:$16 sps:$4 sm:$0xff]   ;;  %v2798_v10 = vld [vmem:[#allocation2 + $0x1c4] ss:$16 sps:$4 sm:$0xff]   ;;  %v106_v19 = vcombine.low %v89_v62, %v103_v1  ;;  %v3303_v22 = vpack.c.bf16 %v104_v18, %v104_v18  ;;  %v2869_v61 = vld [vmem:[#allocation2 + $0x10c] ss:$16 sps:$4 sm:$0xff]  }
  0x45   :  { %1374 = vmatpush1.bf16.msra.mxu1 %v2760_v30  ;;  %v2797_v8 = vld [vmem:[#allocation2 + $0x3a0] ss:$16 sps:$4 sm:$0xff]   ;;  %v2800_v11 = vld [vmem:[#allocation2 + $0x3c4] ss:$16 sps:$4 sm:$0xff]   ;;  %v2867_v1 = vld [vmem:[#allocation2 + $0x108] ss:$16 sps:$4 sm:$0xff]  }
  0x46   :  { %1415 = vmatpush1.bf16.msra.mxu0 %v2761_v31  ;;  %1375 = vmatprep.subr.bf16.mxu1 %v2762_v32  ;;  %v3300_v9 = vpack.c.bf16 %v107_v5, %v107_v5  ;;  %v2802_v12 = vld [vmem:[#allocation2 + $0x1c0] ss:$16 sps:$4 sm:$0xff]   ;;  %v2804_v14 = vld [vmem:[#allocation2 + $0x1e4] ss:$16 sps:$4 sm:$0xff]   ;;  %v3305_v25 = vpack.c.bf16 %v106_v19, %v106_v19  ;;  %v2833_v31 = vld [vmem:[#allocation2 + $0x4c] ss:$16 sps:$4 sm:$0xff]  }
  0x47   :  { %1416 = vmatprep.subr.bf16.mxu0 %v2764_v33  ;;  %1391 = vmatprep.mubr.bf16.mxu1 %v151_v6  ;;  %v2803_v13 = vld [vmem:[#allocation2 + $0x3c0] ss:$16 sps:$4 sm:$0xff]   ;;  %v2806_v15 = vld [vmem:[#allocation2 + $0x3e4] ss:$16 sps:$4 sm:$0xff]   ;;  %v2831_v33 = vld [vmem:[#allocation2 + $0x48] ss:$16 sps:$4 sm:$0xff]  }
  0x48   :  { %1432 = vmatprep.mubr.bf16.mxu0 %v3300_v9  ;;  %v2808_v16 = vld [vmem:[#allocation2 + $0x1e0] ss:$16 sps:$4 sm:$0xff]   ;;  %v2818_v20 = vld [vmem:[#allocation2 + $0x404] ss:$16 sps:$4 sm:$0xff]   ;;  %v2875_v3 = vld [vmem:[#allocation2 + $0x12c] ss:$16 sps:$4 sm:$0xff]  }
  0x49   :  { %1376 = vmatpush1.bf16.msra.mxu1 %v2766_v34  ;;  %v2809_v17 = vld [vmem:[#allocation2 + $0x3e0] ss:$16 sps:$4 sm:$0xff]   ;;  %v2824_v26 = vld [vmem:[#allocation2 + $0x424] ss:$16 sps:$4 sm:$0xff]   ;;  %v2873_v5 = vld [vmem:[#allocation2 + $0x128] ss:$16 sps:$4 sm:$0xff]  }
  0x4a   :  { %1417 = vmatpush1.bf16.msra.mxu0 %v2767_v35  ;;  %1377 = vmatprep.subr.bf16.mxu1 %v2768_v36  ;;  %v2816_v23 = vld [vmem:[#allocation2 + $0x400] ss:$16 sps:$4 sm:$0xff]   ;;  %v2830_v30 = vld [vmem:[#allocation2 + $0x444] ss:$16 sps:$4 sm:$0xff]   ;;  %v2839_v35 = vld [vmem:[#allocation2 + $0x6c] ss:$16 sps:$4 sm:$0xff]  }
  0x4b   :  { %1418 = vmatprep.subr.bf16.mxu0 %v2770_v37  ;;  %v2822_v28 = vld [vmem:[#allocation2 + $0x420] ss:$16 sps:$4 sm:$0xff]   ;;  %v2836_v34 = vld [vmem:[#allocation2 + $0x464] ss:$16 sps:$4 sm:$0xff]   ;;  %v2837_v37 = vld [vmem:[#allocation2 + $0x68] ss:$16 sps:$4 sm:$0xff]  }
  0x4c   :  { %v2828_v32 = vld [vmem:[#allocation2 + $0x440] ss:$16 sps:$4 sm:$0xff]   ;;  %v2842_v38 = vld [vmem:[#allocation2 + $0x484] ss:$16 sps:$4 sm:$0xff]   ;;  %v2891_v18 = vld [vmem:[#allocation2 + $0x188] ss:$16 sps:$4 sm:$0xff]  }
  0x4d   :  { %1378 = vmatpush1.bf16.msra.mxu1 %v2772_v41  ;;  %v2834_v36 = vld [vmem:[#allocation2 + $0x460] ss:$16 sps:$4 sm:$0xff]   ;;  %v2843_v41 = vld [vmem:[#allocation2 + $0x88] ss:$16 sps:$4 sm:$0xff]   ;;  %v2866_v60 = vld [vmem:[#allocation2 + $0x504] ss:$16 sps:$4 sm:$0xff]  }
  0x4e   :  { %1419 = vmatpush1.bf16.msra.mxu0 %v2773_v42  ;;  %1379 = vmatprep.subr.bf16.mxu1 %v2774_v43  ;;  %v2840_v40 = vld [vmem:[#allocation2 + $0x480] ss:$16 sps:$4 sm:$0xff]   ;;  %v2848_v42 = vld [vmem:[#allocation2 + $0x4a4] ss:$16 sps:$4 sm:$0xff]   ;;  %v2851_v43 = vld [vmem:[#allocation2 + $0xac] ss:$16 sps:$4 sm:$0xff]  }
  0x4f   :  { %1420 = vmatprep.subr.bf16.mxu0 %v2776_v44  ;;  %v2846_v44 = vld [vmem:[#allocation2 + $0x4a0] ss:$16 sps:$4 sm:$0xff]   ;;  %v2896_v19 = vld [vmem:[#allocation2 + $0x5a4] ss:$16 sps:$4 sm:$0xff]  }
  0x50   :  { %v2858_v56 = vld [vmem:[#allocation2 + $0x4e0] ss:$16 sps:$4 sm:$0xff]  }
  0x51   :  { %1380 = vmatpush1.bf16.msra.mxu1 %v2778_v47  ;;  %v2854_v47 = vld [vmem:[#allocation2 + $0x4c4] ss:$16 sps:$4 sm:$0xff]  }
  0x52   :  { %1421 = vmatpush1.bf16.msra.mxu0 %v2779_v48  ;;  %1381 = vmatprep.subr.bf16.mxu1 %v2780_v49  ;;  %v2857_v48 = vld [vmem:[#allocation2 + $0xcc] ss:$16 sps:$4 sm:$0xff]   ;;  %v2852_v49 = vld [vmem:[#allocation2 + $0x4c0] ss:$16 sps:$4 sm:$0xff]  }
  0x53   :  { %1422 = vmatprep.subr.bf16.mxu0 %v2782_v50  ;;  %v2855_v50 = vld [vmem:[#allocation2 + $0xc8] ss:$16 sps:$4 sm:$0xff]  }
  0x55   :  { %1382 = vmatpush1.bf16.msra.mxu1 %v2784_v51  ;;  %v2860_v51 = vld [vmem:[#allocation2 + $0x4e4] ss:$16 sps:$4 sm:$0xff]  }
  0x56   :  { %1423 = vmatpush1.bf16.msra.mxu0 %v2785_v52  ;;  %1383 = vmatprep.subr.bf16.mxu1 %v2786_v54  ;;  %v2863_v52 = vld [vmem:[#allocation2 + $0xec] ss:$16 sps:$4 sm:$0xff]   ;;  %v2912_v54 = vld [vmem:[%s3437_s0 + $0x8] ss:$14 sps:$4 sm:$0xff]  }
  0x57   :  { %1424 = vmatprep.subr.bf16.mxu0 %v2788_v55  ;;  %v2915_v55 = vld [vmem:[%s3437_s0 + $0x24] ss:$14 sps:$4 sm:$0xff]   ;;  %v3316_v57 = vrot.slane %v2912_v54, %v3282_v53 }
  0x58   :  { %v3319_v58 = vrot.slane %v2915_v55, %v3282_v53  ;;  %v2933_v55 = vld [vmem:[#allocation2 + $0x288] ss:$16 sps:$4 sm:$0xff]  }
  0x59   :  { %1384 = vmatpush1.bf16.msra.mxu1 %v2790_v63  ;;  %v2864_v63 = vld [vmem:[#allocation2 + $0x500] ss:$16 sps:$4 sm:$0xff]  }
  0x5a   :  { %1425 = vmatpush1.bf16.msra.mxu0 %v2791_v0  ;;  %1385 = vmatprep.subr.bf16.mxu1 %v2792_v2  ;;  %v141_v62 = vcombine.high %v3316_v57, %v3319_v58  ;;  %v2872_v2 = vld [vmem:[#allocation2 + $0x524] ss:$16 sps:$4 sm:$0xff]  }
  0x5b   :  { %1426 = vmatprep.subr.bf16.mxu0 %v2794_v4  ;;  %v2870_v4 = vld [vmem:[#allocation2 + $0x520] ss:$16 sps:$4 sm:$0xff]  }
  0x5c   :  { %v3323_v0 = vpack.c.bf16 %v141_v62, %v141_v62  ;;  %v3025_v62 = vld [vmem:[#allocation5 + $0x14] ss:$8 sps:$4 sm:$0xff]  }
  0x5d   :  { %1386 = vmatpush1.bf16.msra.mxu1 %v2796_v7  ;;  %v2881_v7 = vld [vmem:[#allocation2 + $0x14c] ss:$16 sps:$4 sm:$0xff]  }
  0x5e   :  { %1427 = vmatpush1.bf16.msra.mxu0 %v2797_v8  ;;  %1387 = vmatprep.subr.bf16.mxu1 %v2798_v10  ;;  %v2876_v8 = vld [vmem:[#allocation2 + $0x540] ss:$16 sps:$4 sm:$0xff]   ;;  %v2879_v10 = vld [vmem:[#allocation2 + $0x148] ss:$16 sps:$4 sm:$0xff]  }
  0x5f   :  { %1428 = vmatprep.subr.bf16.mxu0 %v2800_v11  ;;  %v2884_v11 = vld [vmem:[#allocation2 + $0x564] ss:$16 sps:$4 sm:$0xff]  }
  0x61   :  { %1388 = vmatpush1.bf16.msra.mxu1 %v2802_v12  ;;  %v2887_v12 = vld [vmem:[#allocation2 + $0x16c] ss:$16 sps:$4 sm:$0xff]  }
  0x62   :  { %1429 = vmatpush1.bf16.msra.mxu0 %v2803_v13  ;;  %1389 = vmatprep.subr.bf16.mxu1 %v2804_v14  ;;  %v2882_v13 = vld [vmem:[#allocation2 + $0x560] ss:$16 sps:$4 sm:$0xff]   ;;  %v2885_v14 = vld [vmem:[#allocation2 + $0x168] ss:$16 sps:$4 sm:$0xff]  }
  0x63   :  { %1430 = vmatprep.subr.bf16.mxu0 %v2806_v15  ;;  %v2890_v15 = vld [vmem:[#allocation2 + $0x584] ss:$16 sps:$4 sm:$0xff]  }
  0x65   :  { %1390 = vmatpush1.bf16.msra.mxu1 %v2808_v16  ;;  %v2893_v16 = vld [vmem:[#allocation2 + $0x18c] ss:$16 sps:$4 sm:$0xff]  }
  0x66   :  { %1431 = vmatpush1.bf16.msra.mxu0 %v2809_v17  ;;  %1523 = vmatprep.subr.bf16.mxu1 %v2821_v21  ;;  %v2888_v17 = vld [vmem:[#allocation2 + $0x580] ss:$16 sps:$4 sm:$0xff]  }
  0x67   :  { %1441 = vmatprep.subr.bf16.mxu0 %v2818_v20  ;;  %v2899_v20 = vld [vmem:[#allocation2 + $0x1ac] ss:$16 sps:$4 sm:$0xff]   ;;  %v2894_v21 = vld [vmem:[#allocation2 + $0x5a0] ss:$16 sps:$4 sm:$0xff]  }
  0x68   :  { %1392 = vmatmul.mubr.bf16.vlgmr.msra.gmra.mrb[0].mxu1 %v3303_v22 }
  0x69   :  { %1433 = vmatmul.mubr.bf16.vlgmr.msra.gmra.mrb[0].mxu0 %v3305_v25  ;;  %1524 = vmatpush1.bf16.msra.mxu1 %v2819_v24  ;;  %v2902_v24 = vld [vmem:[#allocation2 + $0x5c4] ss:$16 sps:$4 sm:$0xff]  }
  0x6a   :  { %1442 = vmatpush1.bf16.msra.mxu0 %v2816_v23  ;;  %1525 = vmatprep.subr.bf16.mxu1 %v2827_v27  ;;  %v2897_v23 = vld [vmem:[#allocation2 + $0x1a8] ss:$16 sps:$4 sm:$0xff]   ;;  %v2900_v27 = vld [vmem:[#allocation2 + $0x5c0] ss:$16 sps:$4 sm:$0xff]  }
  0x6b   :  { %1443 = vmatprep.subr.bf16.mxu0 %v2824_v26  ;;  %1555 = vmatprep.mubr.bf16.mxu1 %v151_v6  ;;  %v2878_v6 = vld [vmem:[#allocation2 + $0x544] ss:$16 sps:$4 sm:$0xff]   ;;  %v2905_v26 = vld [vmem:[#allocation2 + $0x1cc] ss:$16 sps:$4 sm:$0xff]  }
  0x6c   :  { %1473 = vmatprep.mubr.bf16.mxu0 %v3323_v0 }
  0x6d   :  { %1526 = vmatpush1.bf16.msra.mxu1 %v2825_v29  ;;  %v2908_v29 = vld [vmem:[#allocation2 + $0x5e4] ss:$16 sps:$4 sm:$0xff]  }
  0x6e   :  { %1444 = vmatpush1.bf16.msra.mxu0 %v2822_v28  ;;  %1527 = vmatprep.subr.bf16.mxu1 %v2833_v31  ;;  %v2903_v28 = vld [vmem:[#allocation2 + $0x1c8] ss:$16 sps:$4 sm:$0xff]   ;;  %v2906_v31 = vld [vmem:[#allocation2 + $0x5e0] ss:$16 sps:$4 sm:$0xff]  }
  0x6f   :  { %1445 = vmatprep.subr.bf16.mxu0 %v2830_v30  ;;  %v2911_v30 = vld [vmem:[#allocation2 + $0x1ec] ss:$16 sps:$4 sm:$0xff]  }
  0x71   :  { %1528 = vmatpush1.bf16.msra.mxu1 %v2831_v33  ;;  %v2909_v33 = vld [vmem:[#allocation2 + $0x1e8] ss:$16 sps:$4 sm:$0xff]  }
  0x72   :  { %1446 = vmatpush1.bf16.msra.mxu0 %v2828_v32  ;;  %1529 = vmatprep.subr.bf16.mxu1 %v2839_v35  ;;  %v140_v32 = vcombine.low %v3316_v57, %v3319_v58  ;;  %v2920_v35 = vld [vmem:[#allocation2 + $0x20c] ss:$16 sps:$4 sm:$0xff]   ;;  %v2939_v58 = vld [vmem:[#allocation2 + $0x2c8] ss:$16 sps:$4 sm:$0xff]  }
  0x73   :  { %1447 = vmatprep.subr.bf16.mxu0 %v2836_v34  ;;  %v2914_v34 = vld [vmem:[%s3437_s0 + $0xc] ss:$14 sps:$4 sm:$0x33]  }
  0x74   :  { %v2941_v57 = vld [vmem:[#allocation2 + $0x2cc] ss:$16 sps:$4 sm:$0xff]  }
  0x75   :  { %1530 = vmatpush1.bf16.msra.mxu1 %v2837_v37  ;;  %v2917_v37 = vld [vmem:[%s3437_s0 + $0x28] ss:$14 sps:$4 sm:$0x33]  }
  0x76   :  { %1448 = vmatpush1.bf16.msra.mxu0 %v2834_v36  ;;  %1531 = vmatprep.subr.bf16.mxu1 %v2845_v39  ;;  %v2926_v36 = vld [vmem:[#allocation2 + $0x604] ss:$16 sps:$4 sm:$0xff]   ;;  %v2918_v39 = vld [vmem:[#allocation2 + $0x208] ss:$16 sps:$4 sm:$0xff]  }
  0x77   :  { %1449 = vmatprep.subr.bf16.mxu0 %v2842_v38  ;;  %v3334_v38 = vpack.c.bf16 %v140_v32, %v140_v32  ;;  %v3044_v32 = vld [vmem:[#allocation5 + $0x80] ss:$8 sps:$4 sm:$0xff]  }
  0x79   :  { %1532 = vmatpush1.bf16.msra.mxu1 %v2843_v41  ;;  %v2923_v41 = vld [vmem:[#allocation2 + $0x22c] ss:$16 sps:$4 sm:$0xff]  }
  0x7a   :  { %1450 = vmatpush1.bf16.msra.mxu0 %v2840_v40  ;;  %1533 = vmatprep.subr.bf16.mxu1 %v2851_v43  ;;  %v2924_v40 = vld [vmem:[#allocation2 + $0x600] ss:$16 sps:$4 sm:$0xff]   ;;  %v139_v43 = vrot.slane %v2917_v37, %v3282_v53  ;;  %v2971_v37 = vld [vmem:[#allocation2 + $0x40c] ss:$16 sps:$4 sm:$0xff]  }
  0x7b   :  { %1451 = vmatprep.subr.bf16.mxu0 %v2848_v42  ;;  %v125_v42 = vrot.slane %v2914_v34, %v3282_v53  ;;  %v2930_v53 = vld [vmem:[#allocation2 + $0x268] ss:$16 sps:$4 sm:$0xff]   ;;  %v3049_v34 = vld [vmem:[#allocation5 + $0x94] ss:$8 sps:$4 sm:$0xff]  }
  0x7d   :  { %1534 = vmatpush1.bf16.msra.mxu1 %v2849_v45  ;;  %v2929_v45 = vld [vmem:[#allocation2 + $0x24c] ss:$16 sps:$4 sm:$0xff]  }
  0x7e   :  { %1452 = vmatpush1.bf16.msra.mxu0 %v2846_v44  ;;  %1535 = vmatprep.subr.bf16.mxu1 %v2857_v48  ;;  %v2921_v44 = vld [vmem:[#allocation2 + $0x228] ss:$16 sps:$4 sm:$0xff]   ;;  %v3016_v48 = vld [vmem:[#allocation2 + $0x60c] ss:$16 sps:$4 sm:$0xff]  }
  0x7f   :  { %1453 = vmatprep.subr.bf16.mxu0 %v2854_v47  ;;  %v3211_v47 = vmov 0  }
  0x81   :  { %1536 = vmatpush1.bf16.msra.mxu1 %v2855_v50  ;;  %v2927_v50 = vld [vmem:[#allocation2 + $0x248] ss:$16 sps:$4 sm:$0xff]  }
  0x82   :  { %1454 = vmatpush1.bf16.msra.mxu0 %v2852_v49  ;;  %1537 = vmatprep.subr.bf16.mxu1 %v2863_v52  ;;  %v142_v49 = vcombine.low %v125_v42, %v139_v43  ;;  %v3014_v52 = vld [vmem:[#allocation2 + $0x608] ss:$16 sps:$4 sm:$0xff]   ;;  %v3055_v43 = vld [vmem:[#allocation5 + $0xb4] ss:$8 sps:$4 sm:$0xff]  }
  0x83   :  { %1455 = vmatprep.subr.bf16.mxu0 %v2860_v51  ;;  %v2932_v51 = vld [vmem:[#allocation2 + $0x26c] ss:$16 sps:$4 sm:$0xff]   ;;  %v3050_v42 = vld [vmem:[#allocation5 + $0xa0] ss:$8 sps:$4 sm:$0xff]  }
  0x84   :  { %v156_v54 = vpack.c.bf16 %v142_v49, %v142_v49  ;;  %v2975_v49 = vld [vmem:[#allocation2 + $0x448] ss:$16 sps:$4 sm:$0xff]  }
  0x85   :  { %1538 = vmatpush1.bf16.msra.mxu1 %v2861_v59  ;;  %v2944_v59 = vld [vmem:[#allocation2 + $0x2ec] ss:$16 sps:$4 sm:$0xff]  }
  0x86   :  { %1456 = vmatpush1.bf16.msra.mxu0 %v2858_v56  ;;  %1539 = vmatprep.subr.bf16.mxu1 %v2869_v61  ;;  %v2938_v56 = vld [vmem:[#allocation2 + $0x2ac] ss:$16 sps:$4 sm:$0xff]  }
  0x87   :  { %1457 = vmatprep.subr.bf16.mxu0 %v2866_v60  ;;  %v3020_v60 = vld [vmem:[#allocation5] ss:$8 sps:$4 sm:$0xff]   ;;  %v3022_v61 = vld [vmem:[#allocation5 + $0x4] ss:$8 sps:$4 sm:$0xff]  }
  0x89   :  { %1540 = vmatpush1.bf16.msra.mxu1 %v2867_v1  ;;  %v3023_v1 = vld [vmem:[#allocation5 + $0x10] ss:$8 sps:$4 sm:$0xff]  }
  0x8a   :  { %1458 = vmatpush1.bf16.msra.mxu0 %v2864_v63  ;;  %1541 = vmatprep.subr.bf16.mxu1 %v2875_v3  ;;  %v2942_v63 = vld [vmem:[#allocation2 + $0x2e8] ss:$16 sps:$4 sm:$0xff]   ;;  %v3028_v3 = vld [vmem:[#allocation5 + $0x24] ss:$8 sps:$4 sm:$0xff]  }
  0x8b   :  { %1459 = vmatprep.subr.bf16.mxu0 %v2872_v2  ;;  %v2947_v2 = vld [vmem:[#allocation2 + $0x30c] ss:$16 sps:$4 sm:$0xff]  }
  0x8d   :  { %1542 = vmatpush1.bf16.msra.mxu1 %v2873_v5  ;;  %v3026_v5 = vld [vmem:[#allocation5 + $0x20] ss:$8 sps:$4 sm:$0xff]  }
  0x8e   :  { %1460 = vmatpush1.bf16.msra.mxu0 %v2870_v4  ;;  %1543 = vmatprep.subr.bf16.mxu1 %v2881_v7  ;;  %v2945_v4 = vld [vmem:[#allocation2 + $0x308] ss:$16 sps:$4 sm:$0xff]   ;;  %v3031_v7 = vld [vmem:[#allocation5 + $0x34] ss:$8 sps:$4 sm:$0xff]  }
  0x8f   :  { %1461 = vmatprep.subr.bf16.mxu0 %v2878_v6  ;;  %v2950_v6 = vld [vmem:[#allocation2 + $0x32c] ss:$16 sps:$4 sm:$0xff]  }
  0x91   :  { %1544 = vmatpush1.bf16.msra.mxu1 %v2879_v10  ;;  %v3029_v10 = vld [vmem:[#allocation5 + $0x30] ss:$8 sps:$4 sm:$0xff]  }
  0x92   :  { %1462 = vmatpush1.bf16.msra.mxu0 %v2876_v8  ;;  %1545 = vmatprep.subr.bf16.mxu1 %v2887_v12  ;;  %v2948_v8 = vld [vmem:[#allocation2 + $0x328] ss:$16 sps:$4 sm:$0xff]   ;;  %v3034_v12 = vld [vmem:[#allocation5 + $0x44] ss:$8 sps:$4 sm:$0xff]  }
  0x93   :  { %1463 = vmatprep.subr.bf16.mxu0 %v2884_v11  ;;  %v2953_v11 = vld [vmem:[#allocation2 + $0x34c] ss:$16 sps:$4 sm:$0xff]  }
  0x95   :  { %1546 = vmatpush1.bf16.msra.mxu1 %v2885_v14  ;;  %v3032_v14 = vld [vmem:[#allocation5 + $0x40] ss:$8 sps:$4 sm:$0xff]  }
  0x96   :  { %1464 = vmatpush1.bf16.msra.mxu0 %v2882_v13  ;;  %1547 = vmatprep.subr.bf16.mxu1 %v2893_v16  ;;  %v2951_v13 = vld [vmem:[#allocation2 + $0x348] ss:$16 sps:$4 sm:$0xff]   ;;  %v3037_v16 = vld [vmem:[#allocation5 + $0x54] ss:$8 sps:$4 sm:$0xff]  }
  0x97   :  { %1465 = vmatprep.subr.bf16.mxu0 %v2890_v15  ;;  %v2956_v15 = vld [vmem:[#allocation2 + $0x36c] ss:$16 sps:$4 sm:$0xff]  }
  0x99   :  { %1548 = vmatpush1.bf16.msra.mxu1 %v2891_v18  ;;  %v3035_v18 = vld [vmem:[#allocation5 + $0x50] ss:$8 sps:$4 sm:$0xff]  }
  0x9a   :  { %1466 = vmatpush1.bf16.msra.mxu0 %v2888_v17  ;;  %1549 = vmatprep.subr.bf16.mxu1 %v2899_v20  ;;  %v2954_v17 = vld [vmem:[#allocation2 + $0x368] ss:$16 sps:$4 sm:$0xff]   ;;  %v3040_v20 = vld [vmem:[#allocation5 + $0x64] ss:$8 sps:$4 sm:$0xff]  }
  0x9b   :  { %1467 = vmatprep.subr.bf16.mxu0 %v2896_v19  ;;  %v2959_v19 = vld [vmem:[#allocation2 + $0x38c] ss:$16 sps:$4 sm:$0xff]  }
  0x9d   :  { %1550 = vmatpush1.bf16.msra.mxu1 %v2897_v23  ;;  %v3038_v23 = vld [vmem:[#allocation5 + $0x60] ss:$8 sps:$4 sm:$0xff]  }
  0x9e   :  { %1468 = vmatpush1.bf16.msra.mxu0 %v2894_v21  ;;  %1551 = vmatprep.subr.bf16.mxu1 %v2905_v26  ;;  %v2957_v21 = vld [vmem:[#allocation2 + $0x388] ss:$16 sps:$4 sm:$0xff]   ;;  %v3043_v26 = vld [vmem:[#allocation5 + $0x74] ss:$8 sps:$4 sm:$0xff]  }
  0x9f   :  { %1469 = vmatprep.subr.bf16.mxu0 %v2902_v24  ;;  %v2962_v24 = vld [vmem:[#allocation2 + $0x3ac] ss:$16 sps:$4 sm:$0xff]  }
  0xa1   :  { %1552 = vmatpush1.bf16.msra.mxu1 %v2903_v28  ;;  %v3041_v28 = vld [vmem:[#allocation5 + $0x70] ss:$8 sps:$4 sm:$0xff]  }
  0xa2   :  { %1470 = vmatpush1.bf16.msra.mxu0 %v2900_v27  ;;  %1553 = vmatprep.subr.bf16.mxu1 %v2911_v30  ;;  %v2960_v27 = vld [vmem:[#allocation2 + $0x3a8] ss:$16 sps:$4 sm:$0xff]   ;;  %v3046_v30 = vld [vmem:[#allocation5 + $0x84] ss:$8 sps:$4 sm:$0xff]  }
  0xa3   :  { %1471 = vmatprep.subr.bf16.mxu0 %v2908_v29  ;;  %v2965_v29 = vld [vmem:[#allocation2 + $0x3cc] ss:$16 sps:$4 sm:$0xff]  }
  0xa5   :  { %1554 = vmatpush1.bf16.msra.mxu1 %v2909_v33  ;;  %v2968_v33 = vld [vmem:[#allocation2 + $0x3ec] ss:$16 sps:$4 sm:$0xff]  }
  0xa6   :  { %1472 = vmatpush1.bf16.msra.mxu0 %v2906_v31  ;;  %1564 = vmatprep.subr.bf16.mxu1 %v2920_v35  ;;  %v2963_v31 = vld [vmem:[#allocation2 + $0x3c8] ss:$16 sps:$4 sm:$0xff]  }
  0xa7   :  { %1482 = vmatprep.subr.bf16.mxu0 %v2926_v36  ;;  %v2966_v35 = vld [vmem:[#allocation2 + $0x3e8] ss:$16 sps:$4 sm:$0xff]  }
  0xa8   :  { %1556 = vmatmul.mubr.bf16.vlgmr.msra.gmra.mrb[4].mxu1 %v3303_v22  ;;  %v2935_v22 = vld [vmem:[#allocation2 + $0x28c] ss:$16 sps:$4 sm:$0xff]   ;;  %v3047_v36 = vld [vmem:[#allocation5 + $0x90] ss:$8 sps:$4 sm:$0xff]  }
  0xa9   :  { %1474 = vmatmul.mubr.bf16.vlgmr.msra.gmra.mrb[0].mxu0 %v3334_v38  ;;  %1565 = vmatpush1.bf16.msra.mxu1 %v2918_v39  ;;  %v3052_v39 = vld [vmem:[#allocation5 + $0xa4] ss:$8 sps:$4 sm:$0xff]  }
  0xaa   :  { %1483 = vmatpush1.bf16.msra.mxu0 %v2924_v40  ;;  %1566 = vmatprep.subr.bf16.mxu1 %v2923_v41  ;;  %v2969_v40 = vld [vmem:[#allocation2 + $0x408] ss:$16 sps:$4 sm:$0xff]   ;;  %v2974_v41 = vld [vmem:[#allocation2 + $0x42c] ss:$16 sps:$4 sm:$0xff]  }
  0xab   :  { %1514 = vmatprep.mubr.bf16.mxu0 %v3211_v47  ;;  %1596 = vmatprep.mubr.bf16.mxu1 %v3300_v9  ;;  %v2936_v9 = vld [vmem:[#allocation2 + $0x2a8] ss:$16 sps:$4 sm:$0xff]  }
  0xac   :  { %1646 = vmatprep.subr.bf16.mxu0 %v3016_v48  ;;  %v3058_v48 = vld [vmem:[#allocation5 + $0xc4] ss:$8 sps:$4 sm:$0xff]  }
  0xad   :  { %1567 = vmatpush1.bf16.msra.mxu1 %v2921_v44  ;;  %v2972_v44 = vld [vmem:[#allocation2 + $0x428] ss:$16 sps:$4 sm:$0xff]  }
  0xae   :  { %1568 = vmatprep.subr.bf16.mxu1 %v2929_v45  ;;  %v2977_v45 = vld [vmem:[#allocation2 + $0x44c] ss:$16 sps:$4 sm:$0xff]  }
  0xb1   :  { %1569 = vmatpush1.bf16.msra.mxu1 %v2927_v50  ;;  %v2980_v50 = vld [vmem:[#allocation2 + $0x46c] ss:$16 sps:$4 sm:$0xff]  }
  0xb2   :  { %1570 = vmatprep.subr.bf16.mxu1 %v2932_v51  ;;  %v3056_v51 = vld [vmem:[#allocation5 + $0xc0] ss:$8 sps:$4 sm:$0xff]  }
  0xb5   :  { %2568 = vmatmul.mubr.msk.bf16.vlgmr.msra.gmra.mrb[0].mxu0 %vm1355_vm0, %v156_v54  ;;  %1571 = vmatpush1.bf16.msra.mxu1 %v2930_v53  ;;  %v3061_v53 = vld [vmem:[#allocation5 + $0xd4] ss:$8 sps:$4 sm:$0xff]  }
  0xb6   :  { %1647 = vmatpush1.bf16.msra.mxu0 %v3014_v52  ;;  %1572 = vmatprep.subr.bf16.mxu1 %v2935_v22  ;;  %v2983_v52 = vld [vmem:[#allocation2 + $0x48c] ss:$16 sps:$4 sm:$0xff]  }
  0xb7   :  { %1678 = vmatprep.mubr.bf16.mxu0 %v3211_v47  ;;  %2091 = vmatprep.subr.bf16.mxu0 %v3022_v61  ;;  %v3053_v47 = vld [vmem:[#allocation5 + $0xb0] ss:$8 sps:$4 sm:$0xff]   ;;  %v2986_v22 = vld [vmem:[#allocation2 + $0x4ac] ss:$16 sps:$4 sm:$0xff]  }
  0xb8   :  { %v2998_v61 = vld [vmem:[#allocation2 + $0x52c] ss:$16 sps:$4 sm:$0xff]  }
  0xb9   :  { %1573 = vmatpush1.bf16.msra.mxu1 %v2933_v55  ;;  %v2984_v55 = vld [vmem:[#allocation2 + $0x4a8] ss:$16 sps:$4 sm:$0xff]  }
  0xba   :  { %1574 = vmatprep.subr.bf16.mxu1 %v2938_v56  ;;  %v2989_v56 = vld [vmem:[#allocation2 + $0x4cc] ss:$16 sps:$4 sm:$0xff]  }
  0xbd   :  { %2569 = vmatmul.mubr.msk.bf16.vlgmr.msra.gmra.mrb[4].mxu0 %vm1355_vm0, %v156_v54  ;;  %1575 = vmatpush1.bf16.msra.mxu1 %v2936_v9  ;;  %v2981_v54 = vld [vmem:[#allocation2 + $0x488] ss:$16 sps:$4 sm:$0xff]  }
  0xbe   :  { %1576 = vmatprep.subr.bf16.mxu1 %v2941_v57  ;;  %2092 = vmatpush1.bf16.msra.mxu0 %v3020_v60  ;;  %v2987_v9 = vld [vmem:[#allocation2 + $0x4c8] ss:$16 sps:$4 sm:$0xff]   ;;  %v2992_v57 = vld [vmem:[#allocation2 + $0x4ec] ss:$16 sps:$4 sm:$0xff]  }
  0xbf   :  { %2093 = vmatprep.subr.bf16.mxu0 %v3025_v62  ;;  %v2993_v60 = vld [vmem:[#allocation2 + $0x508] ss:$16 sps:$4 sm:$0xff]   ;;  %v3064_v62 = vld [vmem:[#allocation5 + $0xe4] ss:$8 sps:$4 sm:$0xff]  }
  0xc1   :  { %1577 = vmatpush1.bf16.msra.mxu1 %v2939_v58  ;;  %v2990_v58 = vld [vmem:[#allocation2 + $0x4e8] ss:$16 sps:$4 sm:$0xff]  }
  0xc2   :  { %1578 = vmatprep.subr.bf16.mxu1 %v2944_v59  ;;  %2094 = vmatpush1.bf16.msra.mxu0 %v3023_v1  ;;  %v2995_v59 = vld [vmem:[#allocation2 + $0x50c] ss:$16 sps:$4 sm:$0xff]   ;;  %v2996_v1 = vld [vmem:[#allocation2 + $0x528] ss:$16 sps:$4 sm:$0xff]  }
  0xc3   :  { %2095 = vmatprep.subr.bf16.mxu0 %v3028_v3  ;;  %v3067_v3 = vld [vmem:[#allocation5 + $0xf4] ss:$8 sps:$4 sm:$0xff]  }
  0xc5   :  { %1579 = vmatpush1.bf16.msra.mxu1 %v2942_v63  ;;  %v3062_v63 = vld [vmem:[#allocation5 + $0xe0] ss:$8 sps:$4 sm:$0xff]  }
  0xc6   :  { %1580 = vmatprep.subr.bf16.mxu1 %v2947_v2  ;;  %2096 = vmatpush1.bf16.msra.mxu0 %v3026_v5  ;;  %v3001_v2 = vld [vmem:[#allocation2 + $0x54c] ss:$16 sps:$4 sm:$0xff]   ;;  %v2999_v5 = vld [vmem:[#allocation2 + $0x548] ss:$16 sps:$4 sm:$0xff]  }
  0xc7   :  { %2097 = vmatprep.subr.bf16.mxu0 %v3031_v7  ;;  %v3070_v7 = vld [vmem:[#allocation5 + $0x104] ss:$8 sps:$4 sm:$0xff]  }
  0xc9   :  { %1581 = vmatpush1.bf16.msra.mxu1 %v2945_v4  ;;  %v3065_v4 = vld [vmem:[#allocation5 + $0xf0] ss:$8 sps:$4 sm:$0xff]  }
  0xca   :  { %1582 = vmatprep.subr.bf16.mxu1 %v2950_v6  ;;  %2098 = vmatpush1.bf16.msra.mxu0 %v3029_v10  ;;  %v3004_v6 = vld [vmem:[#allocation2 + $0x56c] ss:$16 sps:$4 sm:$0xff]  }
  0xcb   :  { %2099 = vmatprep.subr.bf16.mxu0 %v3034_v12  ;;  %v3007_v10 = vld [vmem:[#allocation2 + $0x58c] ss:$16 sps:$4 sm:$0xff]  }
  0xcc   :  { %v3010_v12 = vld [vmem:[#allocation2 + $0x5ac] ss:$16 sps:$4 sm:$0xff]  }
  0xcd   :  { %1583 = vmatpush1.bf16.msra.mxu1 %v2948_v8  ;;  %v3002_v8 = vld [vmem:[#allocation2 + $0x568] ss:$16 sps:$4 sm:$0xff]  }
  0xce   :  { %1584 = vmatprep.subr.bf16.mxu1 %v2953_v11  ;;  %2100 = vmatpush1.bf16.msra.mxu0 %v3032_v14  ;;  %v3005_v11 = vld [vmem:[#allocation2 + $0x588] ss:$16 sps:$4 sm:$0xff]   ;;  %v3013_v14 = vld [vmem:[#allocation2 + $0x5cc] ss:$16 sps:$4 sm:$0xff]  }
  0xcf   :  { %2101 = vmatprep.subr.bf16.mxu0 %v3037_v16  ;;  %v3019_v16 = vld [vmem:[#allocation2 + $0x5ec] ss:$16 sps:$4 sm:$0xff]  }
  0xd1   :  { %1585 = vmatpush1.bf16.msra.mxu1 %v2951_v13  ;;  %v3008_v13 = vld [vmem:[#allocation2 + $0x5a8] ss:$16 sps:$4 sm:$0xff]  }
  0xd2   :  { %1586 = vmatprep.subr.bf16.mxu1 %v2956_v15  ;;  %2102 = vmatpush1.bf16.msra.mxu0 %v3035_v18  ;;  %v3011_v15 = vld [vmem:[#allocation2 + $0x5c8] ss:$16 sps:$4 sm:$0xff]  }
  0xd3   :  { %2103 = vmatprep.subr.bf16.mxu0 %v3040_v20 }
  0xd5   :  { %1587 = vmatpush1.bf16.msra.mxu1 %v2954_v17  ;;  %v3017_v17 = vld [vmem:[#allocation2 + $0x5e8] ss:$16 sps:$4 sm:$0xff]  }
  0xd6   :  { %1588 = vmatprep.subr.bf16.mxu1 %v2959_v19  ;;  %2104 = vmatpush1.bf16.msra.mxu0 %v3038_v23  ;;  %v357_v23 = vsub.s32 0, %v3279_v46 }
  0xd7   :  { %2105 = vmatprep.subr.bf16.mxu0 %v3043_v26  ;;  %v361_v26 = vsub.s32 1, %v3279_v46 }
  0xd9   :  { %1589 = vmatpush1.bf16.msra.mxu1 %v2957_v21 }
  0xda   :  { %1590 = vmatprep.subr.bf16.mxu1 %v2962_v24  ;;  %2106 = vmatpush1.bf16.msra.mxu0 %v3041_v28  ;;  %v3348_v24 = vld [vmem:[%s3439_s2] sm:$0xf] }
  0xdb   :  { %2107 = vmatprep.subr.bf16.mxu0 %v3046_v30  ;;  %v3117_v30 = vld [vmem:[%s3442_s5] sm:$0xff]  }
  0xdd   :  { %1591 = vmatpush1.bf16.msra.mxu1 %v2960_v27  ;;  %v358_v27 = vrot.slane %v3348_v24, %v357_v23 }
  0xde   :  { %1592 = vmatprep.subr.bf16.mxu1 %v2965_v29  ;;  %2108 = vmatpush1.bf16.msra.mxu0 %v3044_v32  ;;  %v3116_v29 = vld [vmem:[%s3442_s5 + $0x40] sm:$0xff]  }
  0xdf   :  { %2109 = vmatprep.subr.bf16.mxu0 %v3049_v34 }
  0xe1   :  { %1593 = vmatpush1.bf16.msra.mxu1 %v2963_v31  ;;  %v3118_v31 = vld [vmem:[%s3442_s5 + $0x48] sm:$0xff]  }
  0xe2   :  { %1594 = vmatprep.subr.bf16.mxu1 %v2968_v33  ;;  %2110 = vmatpush1.bf16.msra.mxu0 %v3047_v36 }
  0xe3   :  { %2111 = vmatprep.subr.bf16.mxu0 %v3052_v39  ;;  %v3119_v39 = vld [vmem:[%s3442_s5 + $0x8] sm:$0xff]  }
  0xe5   :  { %1595 = vmatpush1.bf16.msra.mxu1 %v2966_v35 }
  0xe6   :  { %1605 = vmatprep.subr.bf16.mxu1 %v2971_v37  ;;  %2112 = vmatpush1.bf16.msra.mxu0 %v3050_v42  ;;  %v3120_v42 = vld [vmem:[%s3442_s5 + $0x50] sm:$0xff]  }
  0xe7   :  { %2113 = vmatprep.subr.bf16.mxu0 %v3055_v43 }
  0xe8   :  { %1597 = vmatmul.mubr.bf16.vlgmr.msra.gmra.mrb[4].mxu1 %v3305_v25  ;;  %v2978_v25 = vld [vmem:[#allocation2 + $0x468] ss:$16 sps:$4 sm:$0xff]  }
  0xe9   :  { %1606 = vmatpush1.bf16.msra.mxu1 %v2969_v40  ;;  %1637 = vmatprep.mubr.bf16.mxu1 %v3323_v0  ;;  %v3059_v0 = vld [vmem:[#allocation5 + $0xd0] ss:$8 sps:$4 sm:$0xff]  }
  0xea   :  { %1607 = vmatprep.subr.bf16.mxu1 %v2974_v41  ;;  %2114 = vmatpush1.bf16.msra.mxu0 %v3053_v47  ;;  %v3121_v47 = vld [vmem:[%s3442_s5 + $0x10] sm:$0xff]  }
  0xeb   :  { %2115 = vmatprep.subr.bf16.mxu0 %v3058_v48 }
  0xed   :  { %1608 = vmatpush1.bf16.msra.mxu1 %v2972_v44 }
  0xee   :  { %1609 = vmatprep.subr.bf16.mxu1 %v2977_v45  ;;  %2116 = vmatpush1.bf16.msra.mxu0 %v3056_v51  ;;  %v3068_v45 = vld [vmem:[#allocation5 + $0x100] ss:$8 sps:$4 sm:$0xff]  }
  0xef   :  { %2117 = vmatprep.subr.bf16.mxu0 %v3061_v53 }
  0xf1   :  { %1610 = vmatpush1.bf16.msra.mxu1 %v2975_v49  ;;  %v3073_v49 = vld [vmem:[#allocation5 + $0x114] ss:$8 sps:$4 sm:$0xff]  }
  0xf2   :  { %1611 = vmatprep.subr.bf16.mxu1 %v2980_v50  ;;  %2118 = vmatpush1.bf16.msra.mxu0 %v3059_v0  ;;  %v3122_v50 = vld [vmem:[%s3442_s5 + $0x58] sm:$0xff]  }
  0xf3   :  { %2119 = vmatprep.subr.bf16.mxu0 %v3064_v62  ;;  %v3123_v0 = vld [vmem:[%s3442_s5 + $0x18] sm:$0xff]   ;;  %v3080_v62 = vld [vmem:[#allocation5 + $0x140] ss:$8 sps:$4 sm:$0xff]  }
  0xf5   :  { %1612 = vmatpush1.bf16.msra.mxu1 %v2978_v25  ;;  %v3071_v25 = vld [vmem:[#allocation5 + $0x110] ss:$8 sps:$4 sm:$0xff]  }
  0xf6   :  { %1613 = vmatprep.subr.bf16.mxu1 %v2983_v52  ;;  %2120 = vmatpush1.bf16.msra.mxu0 %v3062_v63  ;;  %v3085_v63 = vld [vmem:[#allocation5 + $0x154] ss:$8 sps:$4 sm:$0xff]  }
  0xf7   :  { %2121 = vmatprep.subr.bf16.mxu0 %v3067_v3  ;;  %v3086_v3 = vld [vmem:[#allocation5 + $0x160] ss:$8 sps:$4 sm:$0xff]  }
  0xf9   :  { %1614 = vmatpush1.bf16.msra.mxu1 %v2981_v54  ;;  %v3076_v54 = vld [vmem:[#allocation5 + $0x124] ss:$8 sps:$4 sm:$0xff]  }
  0xfa   :  { %1615 = vmatprep.subr.bf16.mxu1 %v2986_v22  ;;  %2122 = vmatpush1.bf16.msra.mxu0 %v3065_v4  ;;  %v3091_v4 = vld [vmem:[#allocation5 + $0x174] ss:$8 sps:$4 sm:$0xff]  }
  0xfb   :  { %2132 = vmatprep.subr.bf16.mxu0 %v3070_v7  ;;  %v3092_v7 = vld [vmem:[#allocation5 + $0x180] ss:$8 sps:$4 sm:$0xff]  }
  0xfd   :  { %1616 = vmatpush1.bf16.msra.mxu1 %v2984_v55  ;;  %v3124_v55 = vld [vmem:[%s3442_s5 + $0x60] sm:$0xff]  }
  0xfe   :  { %1617 = vmatprep.subr.bf16.mxu1 %v2989_v56  ;;  %v3074_v56 = vld [vmem:[#allocation5 + $0x120] ss:$8 sps:$4 sm:$0xff]  }
 0x101   :  { %1618 = vmatpush1.bf16.msra.mxu1 %v2987_v9  ;;  %v3125_v9 = vld [vmem:[%s3442_s5 + $0x20] sm:$0xff]  }
 0x102   :  { %1619 = vmatprep.subr.bf16.mxu1 %v2992_v57  ;;  %v3079_v57 = vld [vmem:[#allocation5 + $0x134] ss:$8 sps:$4 sm:$0xff]  }
 0x105   :  { %1620 = vmatpush1.bf16.msra.mxu1 %v2990_v58  ;;  %v3126_v58 = vld [vmem:[%s3442_s5 + $0x68] sm:$0xff]  }
 0x106   :  { %1621 = vmatprep.subr.bf16.mxu1 %v2995_v59  ;;  %v3077_v59 = vld [vmem:[#allocation5 + $0x130] ss:$8 sps:$4 sm:$0xff]  }
 0x109   :  { %1622 = vmatpush1.bf16.msra.mxu1 %v2993_v60  ;;  %v3127_v60 = vld [vmem:[%s3442_s5 + $0x28] sm:$0xff]  }
 0x10a   :  { %1623 = vmatprep.subr.bf16.mxu1 %v2998_v61  ;;  %v3082_v61 = vld [vmem:[#allocation5 + $0x144] ss:$8 sps:$4 sm:$0xff]  }
 0x10d   :  { %1624 = vmatpush1.bf16.msra.mxu1 %v2996_v1  ;;  %v3083_v1 = vld [vmem:[#allocation5 + $0x150] ss:$8 sps:$4 sm:$0xff]  }
 0x10e   :  { %1625 = vmatprep.subr.bf16.mxu1 %v3001_v2  ;;  %v3088_v2 = vld [vmem:[#allocation5 + $0x164] ss:$8 sps:$4 sm:$0xff]  }
 0x111   :  { %1626 = vmatpush1.bf16.msra.mxu1 %v2999_v5  ;;  %v3089_v5 = vld [vmem:[#allocation5 + $0x170] ss:$8 sps:$4 sm:$0xff]  }
 0x112   :  { %1627 = vmatprep.subr.bf16.mxu1 %v3004_v6  ;;  %v3094_v6 = vld [vmem:[#allocation5 + $0x184] ss:$8 sps:$4 sm:$0xff]  }
 0x115   :  { %1628 = vmatpush1.bf16.msra.mxu1 %v3002_v8  ;;  %v3097_v8 = vld [vmem:[#allocation5 + $0x194] ss:$8 sps:$4 sm:$0xff]  }
 0x116   :  { %1629 = vmatprep.subr.bf16.mxu1 %v3007_v10  ;;  %v3095_v10 = vld [vmem:[#allocation5 + $0x190] ss:$8 sps:$4 sm:$0xff]  }
 0x119   :  { %1630 = vmatpush1.bf16.msra.mxu1 %v3005_v11  ;;  %v3100_v11 = vld [vmem:[#allocation5 + $0x1a4] ss:$8 sps:$4 sm:$0xff]  }
 0x11a   :  { %1631 = vmatprep.subr.bf16.mxu1 %v3010_v12  ;;  %v3098_v12 = vld [vmem:[#allocation5 + $0x1a0] ss:$8 sps:$4 sm:$0xff]  }
 0x11d   :  { %1632 = vmatpush1.bf16.msra.mxu1 %v3008_v13  ;;  %v3103_v13 = vld [vmem:[#allocation5 + $0x1b4] ss:$8 sps:$4 sm:$0xff]  }
 0x11e   :  { %1633 = vmatprep.subr.bf16.mxu1 %v3013_v14  ;;  %v3101_v14 = vld [vmem:[#allocation5 + $0x1b0] ss:$8 sps:$4 sm:$0xff]  }
 0x121   :  { %1634 = vmatpush1.bf16.msra.mxu1 %v3011_v15  ;;  %v3106_v15 = vld [vmem:[#allocation5 + $0x1c4] ss:$8 sps:$4 sm:$0xff]  }
 0x122   :  { %1635 = vmatprep.subr.bf16.mxu1 %v3019_v16  ;;  %v3104_v16 = vld [vmem:[#allocation5 + $0x1c0] ss:$8 sps:$4 sm:$0xff]  }
 0x125   :  { %1636 = vmatpush1.bf16.msra.mxu1 %v3017_v17  ;;  %v3109_v17 = vld [vmem:[#allocation5 + $0x1d4] ss:$8 sps:$4 sm:$0xff]  }
 0x126   :  { %2651 = vmatprep.subr.bf16.mxu1 %v3116_v29 }
 0x128   :  { %1638 = vmatmul.mubr.bf16.vlgmr.msra.gmra.mrb[4].mxu1 %v3334_v38  ;;  %v362_v38 = vrot.slane %v3348_v24, %v361_v26 }
 0x129   :  { %2652 = vmatpush3.bf16.msra.mxu1 %v3117_v30 }
 0x12a   :  { %2653 = vmatprep.subr.bf16.mxu1 %v3118_v31 }
 0x12d   :  { %2654 = vmatpush3.bf16.msra.mxu1 %v3119_v39 }
 0x12e   :  { %2655 = vmatprep.subr.bf16.mxu1 %v3120_v42 }
 0x131   :  { %2656 = vmatpush3.bf16.msra.mxu1 %v3121_v47  ;;  %v3131_v47 = vld [vmem:[%s3442_s5 + $0x38] sm:$0xff]  }
 0x132   :  { %2657 = vmatprep.subr.bf16.mxu1 %v3122_v50 }
 0x135   :  { %2658 = vmatpush3.bf16.msra.mxu1 %v3123_v0 }
 0x136   :  { %2659 = vmatprep.subr.bf16.mxu1 %v3124_v55 }
 0x139   :  { %2660 = vmatpush3.bf16.msra.mxu1 %v3125_v9 }
 0x13a   :  { %2661 = vmatprep.subr.bf16.mxu1 %v3126_v58 }
 0x13b   :  { %v1393_v18 = vpop.f32.mrb[0].mxu1 }
 0x13c   :  { %v1395_v19 = vpop.f32.mrb[1].mxu1  ;;  %v1394_v28 = vadd.f32 %v1393_v18, %v358_v27  ;;  %v3107_v18 = vld [vmem:[#allocation5 + $0x1d0] ss:$8 sps:$4 sm:$0xff]  }
 0x13d   :  { %v1397_v20 = vpop.f32.mrb[2].mxu1  ;;  %v1396_v32 = vadd.f32 %v1395_v19, %v362_v38  ;;  %2662 = vmatpush3.bf16.msra.mxu1 %v3127_v60  ;;  %v3112_v19 = vld [vmem:[#allocation5 + $0x1e4] ss:$8 sps:$4 sm:$0xff]   ;;  %v3113_v27 = vld [vmem:[#allocation5 + $0x1f0] ss:$8 sps:$4 sm:$0xff]   ;;  %v365_v38 = vsub.s32 2, %v3279_v46 }
 0x13e   :  { %v1398_v21 = vpop.f32.mrb[3].mxu1  ;;  %v3110_v20 = vld [vmem:[#allocation5 + $0x1e0] ss:$8 sps:$4 sm:$0xff]  }
 0x13f   :  { %v3115_v21 = vld [vmem:[#allocation5 + $0x1f4] ss:$8 sps:$4 sm:$0xff]   ;;  %v366_v29 = vrot.slane %v3348_v24, %v365_v38 }
 0x188   :  { %v1516_v33 = vpop.f32.mrb[0].mxu0 }
 0x189   :  { %v2674_v34 = vadd.f32 %v1516_v33, %v1394_v28  ;;  %v1518_v35 = vpop.f32.mrb[1].mxu0  ;;  %v369_v28 = vsub.s32 3, %v3279_v46 }
 0x18a   :  { %v2676_v36 = vadd.f32 %v1518_v35, %v1396_v32  ;;  %v1520_v37 = vpop.f32.mrb[2].mxu0 }
 0x18b   :  { %v1687_v40 = vmax.f32 %v2674_v34, 0.0  ;;  %v1521_v41 = vpop.f32.mrb[3].mxu0  ;;  %v370_v30 = vrot.slane %v3348_v24, %v369_v28  ;;  %v3128_v24 = vld [vmem:[%s3442_s5 + $0x70] sm:$0xff]  }
 0x18c   :  { %v1688_v43 = vmax.f32 %v2676_v36, 0.0  ;;  %2663 = vmatprep.subr.bf16.mxu1 %v3128_v24 }
 0x18d   :  { %v1691_v48 = vpack.c.bf16 %v1687_v40, %v1687_v40 }
 0x18e   :  { %v1692_v44 = vpack.c.bf16 %v1688_v43, %v1688_v43 }
 0x190   :  { %2123 = vmatprep.mubr.bf16.mxu0 %v1692_v44  ;;  %v3378_v51 = vpop.f32.mrb[4].mxu0  ;;  %v3129_v44 = vld [vmem:[%s3442_s5 + $0x30] sm:$0xff]  }
 0x191   :  { %2124 = vmatmul.mubr.bf16.vlgmr.msra.gmra.mrb[8].mxu0 %v1691_v48  ;;  %v3380_v53 = vpop.f32.mrb[5].mxu0  ;;  %2664 = vmatpush3.bf16.msra.mxu1 %v3129_v44  ;;  %v1759_v48 = vld [vmem:[%s3441_s4] sm:$0x3] }
 0x192   :  { %2133 = vmatpush1.bf16.msra.mxu0 %v3068_v45  ;;  %v1684_v52 = vpop.f32.mrb[6].mxu0  ;;  %v3130_v45 = vld [vmem:[%s3442_s5 + $0x78] sm:$0xff]   ;;  %v1768_v50 = vrot.slane %v1759_v48, %v361_v26 }
 0x193   :  { %2134 = vmatprep.subr.bf16.mxu0 %v3073_v49  ;;  %v1685_v22 = vpop.f32.mrb[7].mxu0  ;;  %2665 = vmatprep.subr.bf16.mxu1 %v3130_v45  ;;  %v1764_v49 = vrot.slane %v1759_v48, %v357_v23  ;;  %v2634_v23 = vld [vmem:[%s3443_s6] ss:$0 sm:$0xff] }
 0x195   :  { %2666 = vmatpush3.bf16.msra.mxu1 %v3131_v47 }
 0x196   :  { %2135 = vmatpush1.bf16.msra.mxu0 %v3071_v25 }
 0x197   :  { %2136 = vmatprep.subr.bf16.mxu0 %v3076_v54 }
 0x19a   :  { %2137 = vmatpush1.bf16.msra.mxu0 %v3074_v56 }
 0x19b   :  { %2138 = vmatprep.subr.bf16.mxu0 %v3079_v57 }
 0x19e   :  { %2139 = vmatpush1.bf16.msra.mxu0 %v3077_v59 }
 0x19f   :  { %2140 = vmatprep.subr.bf16.mxu0 %v3082_v61 }
 0x1a2   :  { %2141 = vmatpush1.bf16.msra.mxu0 %v3080_v62 }
 0x1a3   :  { %2142 = vmatprep.subr.bf16.mxu0 %v3085_v63 }
 0x1a6   :  { %2143 = vmatpush1.bf16.msra.mxu0 %v3083_v1 }
 0x1a7   :  { %2144 = vmatprep.subr.bf16.mxu0 %v3088_v2 }
 0x1aa   :  { %2145 = vmatpush1.bf16.msra.mxu0 %v3086_v3 }
 0x1ab   :  { %2146 = vmatprep.subr.bf16.mxu0 %v3091_v4 }
 0x1ae   :  { %2147 = vmatpush1.bf16.msra.mxu0 %v3089_v5 }
 0x1af   :  { %2148 = vmatprep.subr.bf16.mxu0 %v3094_v6 }
 0x1b2   :  { %2149 = vmatpush1.bf16.msra.mxu0 %v3092_v7 }
 0x1b3   :  { %2150 = vmatprep.subr.bf16.mxu0 %v3097_v8 }
 0x1b6   :  { %2151 = vmatpush1.bf16.msra.mxu0 %v3095_v10 }
 0x1b7   :  { %2152 = vmatprep.subr.bf16.mxu0 %v3100_v11 }
 0x1ba   :  { %2153 = vmatpush1.bf16.msra.mxu0 %v3098_v12 }
 0x1bb   :  { %2154 = vmatprep.subr.bf16.mxu0 %v3103_v13 }
 0x1be   :  { %2155 = vmatpush1.bf16.msra.mxu0 %v3101_v14 }
 0x1bf   :  { %2156 = vmatprep.subr.bf16.mxu0 %v3106_v15 }
 0x1c2   :  { %2157 = vmatpush1.bf16.msra.mxu0 %v3104_v16 }
 0x1c3   :  { %2158 = vmatprep.subr.bf16.mxu0 %v3109_v17 }
 0x1c6   :  { %2159 = vmatpush1.bf16.msra.mxu0 %v3107_v18 }
 0x1c7   :  { %2160 = vmatprep.subr.bf16.mxu0 %v3112_v19 }
 0x1ca   :  { %2161 = vmatpush1.bf16.msra.mxu0 %v3110_v20 }
 0x1cb   :  { %2162 = vmatprep.subr.bf16.mxu0 %v3115_v21 }
 0x1ce   :  { %2163 = vmatpush1.bf16.msra.mxu0 %v3113_v27 }
 0x1fb   :  { %v1639_v31 = vpop.f32.mrb[4].mxu1 }
 0x1fc   :  { %v2677_v32 = vadd.f32 %v1639_v31, %v366_v29  ;;  %v1641_v33 = vpop.f32.mrb[5].mxu1 }
 0x1fd   :  { %v2679_v34 = vadd.f32 %v1641_v33, %v370_v30  ;;  %v1643_v35 = vpop.f32.mrb[6].mxu1 }
 0x1fe   :  { %v2678_v36 = vadd.f32 %v2677_v32, %v3378_v51  ;;  %v1644_v37 = vpop.f32.mrb[7].mxu1 }
 0x1ff   :  { %v2680_v39 = vadd.f32 %v2679_v34, %v3380_v53 }
 0x200   :  { %v1689_v40 = vmax.f32 %v2678_v36, 0.0 }
 0x201   :  { %v1690_v41 = vmax.f32 %v2680_v39, 0.0 }
 0x202   :  { %v1693_v43 = vpack.c.bf16 %v1689_v40, %v1689_v40 }
 0x203   :  { %v1694_v42 = vpack.c.bf16 %v1690_v41, %v1690_v41 }
 0x205   :  { %2164 = vmatprep.mubr.bf16.mxu0 %v1694_v42 }
 0x206   :  { %2165 = vmatmul.mubr.bf16.vlgmr.msra.gmra.mrb[8].mxu0 %v1693_v43 }
 0x2d9   :  { %v2166_v51 = vpop.f32.mrb[8].mxu0 }
 0x2da   :  { %v2681_v53 = vadd.f32 %v2166_v51, %v1764_v49  ;;  %v2168_v25 = vpop.f32.mrb[9].mxu0 }
 0x2db   :  { %v2682_v52 = vadd.f32 %v2168_v25, %v1768_v50  ;;  %v2170_v0 = vpop.f32.mrb[10].mxu0 }
 0x2dc   :  { %v2173_v54 = vmax.f32 %v2681_v53, 0.0  ;;  %v2171_v22 = vpop.f32.mrb[11].mxu0 }
 0x2dd   :  { %v2174_v55 = vmax.f32 %v2682_v52, 0.0 }
 0x2de   :  { %v2175_v9 = vpack.c.bf16 %v2173_v54, %v2173_v54 }
 0x2df   :  { %v2176_v56 = vpack.c.bf16 %v2174_v55, %v2174_v55 }
 0x2e1   :  { %2344 = vmatprep.mubr.bf16.mxu1 %v2176_v56 }
 0x2e2   :  { %2345 = vmatmul.mubr.bf16.vlgmr.msra.gmra.mrb[8].mxu1 %v2175_v9 }
 0x3b5   :  { %v2667_v57 = vpop.f32.mrb[8].mxu1 }
 0x3b6   :  { %v2668_v58 = vpop.f32.mrb[9].mxu1 }
 0x3b7   :  { %v2669_v46 = vadd.f32 %v2668_v58, %v2667_v57  ;;  %v2670_v26 = vpop.f32.mrb[10].mxu1 }
 0x3b8   :  { %v2671_v59 = vpop.f32.mrb[11].mxu1 }
 0x3b9   :  { %v2347_v60 = vadd.f32 %v2669_v46, %v2634_v23 }
 0x3bb   :  { %2353 = vst.msk [vmem:[#allocation7] sm:$0xff] %vm2352_vm1, %v2347_v60 }
 0x3bc   :  { %2358 = vsyncadd [#allocation4], 96  ;;  %s3212_s26 = smov [#allocation7]  }
 0x3bd   :  { %s2359_s27 = sshll.u32 %s3212_s26, 4  ;;  %s2360_s27 = int_to_ptr.vmem [resolvable:$true] %s2359_s27 }
 0x3be   :  { %s3176_s3 = scalar_lea.vmem %s2360_s27, 32  ;;  %s3180_s28 = scalar_lea.vmem %s2360_s27, 128 }
 0x3bf   :  { %p3177_p2 = scmp.ne.s32.totalorder %s2360_s27, %s3176_s3  ;;  %p3181_p3 = scmp.lt.s32.totalorder %s2360_s27, %s2360_s27 }
 0x3c0   :  { %p3182_p4 = scmp.lt.s32.totalorder %s3180_s28, %s3176_s3 }
 0x3c2   :  { %p3183_p5 = por %p3182_p4, %p3181_p3 }
 0x3c4   :  { %p3184_p6 = pnand %p3183_p5, %p3177_p2 }
 0x3c6   :  { %3187 = shalt.err (!%p3184_p6)
}
 0x3c7   :  { %s3188_s30 = scalar_lea.hbm %s3444_s7, 32 }
 0x3c8   :  { %p3189_p7 = scmp.ne.s32.totalorder %s3444_s7, %s3188_s30  ;;  %p3192_p8 = scmp.lt.u32.totalorder %s3188_s30, %s3444_s7 }
 0x3ca   :  { %p3194_p9 = pnand %p3192_p8, %p3189_p7 }
 0x3cc   :  { %3197 = shalt.err (!%p3194_p9)
}
 0x3cd   :  { %s3213_s12 = smov 32   ;;  %s3214_s13 = smov 2  }
 0x3ce   :  { %2365 = dma.vmem_to_hbm [thread:$0]  %s2360_s27, 32, %s3444_s7, [#allocation4], %s3213_s12, %s3213_s12, %s3214_s13  }
 0x3cf   :  { %3202 = dma.done.wait [#allocation4], 128  }
 0x3d0   :  { %3203 = vsyncadd [#allocation4], 4294967168 }
 0x3d1   :  { %2369 = vsyncpa [#allocation3], 1 }
 0x3d2   :  { %2370 = vsyncpa [#allocation6], 1 }
 0x3d3   :  { %2371 = vsyncpa [#allocation4], 1 }

// kernel: tpu_custom_call.1
= control target key start
LH: loop header
LB: loop body
LE: loop exit
PB: predicated region body
PF: predicated region fallthrough
CT: control target
= control target key end

     0   :  { %12 = vsyncpa [#allocation3], 0  ;;  %s3437_s0 = inlined_call_operand.vmem [shape: f32[2,784], index: 0, kind: input, shape index: {}]   ;;  %s3438_s1 = inlined_call_operand.hbm [shape: bf16[784,512], index: 1, kind: input, shape index: {}]   ;;  %s3439_s2 = inlined_call_operand.vmem [shape: f32[1,512], index: 2, kind: input, shape index: {}]   ;;  %s3440_s3 = inlined_call_operand.hbm [shape: bf16[512,256], index: 3, kind: input, shape index: {}]   ;;  %s3441_s4 = inlined_call_operand.vmem [shape: f32[1,256], index: 4, kind: input, shape index: {}]   ;;  %s3442_s5 = inlined_call_operand.vmem [shape: bf16[256,10], index: 5, kind: input, shape index: {}]   ;;  %s3443_s6 = inlined_call_operand.vmem [shape: f32[1,10], index: 6, kind: input, shape index: {}]   ;;  %s3444_s7 = inlined_call_operand.hbm [shape: f32[2,10], index: 7, kind: output, shape index: {}]  }
   0x1   :  { %13 = vsyncpa [#allocation6], 0 }
   0x2   :  { %14 = vsyncpa [#allocation4], 0  ;;  %s3204_s24 = smov [#allocation2]   ;;  %s3132_s28 = scalar_lea.hbm %s3438_s1, 25088 }
   0x3   :  { %s22_s25 = sshll.u32 %s3204_s24, 4  ;;  %p3133_p0 = scmp.ne.s32.totalorder %s3438_s1, %s3132_s28  ;;  %s23_s25 = int_to_ptr.vmem [resolvable:$true] %s22_s25 }
   0x4   :  { %p3136_p1 = scmp.lt.u32.totalorder %s3132_s28, %s3438_s1 }
   0x6   :  { %p3138_p2 = pnand %p3136_p1, %p3133_p0 }
   0x8   :  { %3141 = shalt.err (!%p3138_p2)
}
   0x9   :  { %s3142_s10 = scalar_lea.vmem %s23_s25, 25088  ;;  %p3147_p4 = scmp.lt.s32.totalorder %s23_s25, %s23_s25 }
   0xa   :  { %p3143_p3 = scmp.ne.s32.totalorder %s23_s25, %s3142_s10  ;;  %p3148_p5 = scmp.lt.s32.totalorder %s3142_s10, %s3142_s10 }
   0xc   :  { %p3149_p6 = por %p3148_p5, %p3147_p4 }
   0xe   :  { %p3150_p7 = pnand %p3149_p6, %p3143_p3 }
  0x10   :  { %3153 = shalt.err (!%p3150_p7)
}
  0x11   :  { %s3205_s11 = smov 256   ;;  %s3206_s12 = smov 16  }
  0x12   :  { %28 = dma.hbm_to_vmem [thread:$0]  %s3438_s1, 25088, %s23_s25, [#allocation3], %s3205_s11, %s3205_s11, %s3206_s12  }
  0x13   :  { %s3207_s15 = smov [#allocation5]   ;;  %s3154_s19 = scalar_lea.hbm %s3440_s3, 8192 }
  0x14   :  { %s36_s16 = sshll.u32 %s3207_s15, 4  ;;  %p3155_p8 = scmp.ne.s32.totalorder %s3440_s3, %s3154_s19  ;;  %s37_s16 = int_to_ptr.vmem [resolvable:$true] %s36_s16 }
  0x15   :  { %p3158_p9 = scmp.lt.u32.totalorder %s3154_s19, %s3440_s3 }
  0x17   :  { %p3160_p10 = pnand %p3158_p9, %p3155_p8 }
  0x19   :  { %3163 = shalt.err (!%p3160_p10)
}
  0x1a   :  { %s3164_s24 = scalar_lea.vmem %s37_s16, 8192  ;;  %p3169_p12 = scmp.lt.s32.totalorder %s37_s16, %s37_s16 }
  0x1b   :  { %p3165_p11 = scmp.ne.s32.totalorder %s37_s16, %s3164_s24  ;;  %p3170_p13 = scmp.lt.s32.totalorder %s3164_s24, %s3164_s24 }
  0x1d   :  { %p3171_p0 = por %p3170_p13, %p3169_p12 }
  0x1f   :  { %p3172_p1 = pnand %p3171_p0, %p3165_p11 }
  0x21   :  { %3175 = shalt.err (!%p3172_p1)
}
  0x22   :  { %s3208_s1 = smov 128   ;;  %s3209_s25 = smov 8  }
  0x23   :  { %42 = dma.hbm_to_vmem [thread:$0]  %s3440_s3, 8192, %s37_s16, [#allocation6], %s3208_s1, %s3208_s1, %s3209_s25  }
  0x24   :  { %3198 = dma.done.wait [#allocation3], 25088  }
  0x25   :  { %3199 = vsyncadd [#allocation3], 4294942208 }
  0x26   :  { %3200 = dma.done.wait [#allocation6], 8192  }
  0x27   :  { %3201 = vsyncadd [#allocation6], 4294959104  ;;  %v2714_v0 = vld [vmem:[#allocation2 + $0x4] ss:$16 sps:$4 sm:$0xff]   ;;  %v2718_v2 = vld [vmem:[#allocation2] ss:$16 sps:$4 sm:$0xff]   ;;  %v79_v40 = vlaneseq }
  0x28   :  { %v2716_v1 = vld [vmem:[#allocation2 + $0x204] ss:$16 sps:$4 sm:$0xff]   ;;  %1359 = vmatprep.subr.bf16.mxu1 %v2714_v0  ;;  %v2719_v3 = vld [vmem:[#allocation2 + $0x200] ss:$16 sps:$4 sm:$0xff]   ;;  %v3210_v38 = vmov 1983009808  }
  0x29   :  { %1400 = vmatprep.subr.bf16.mxu0 %v2716_v1  ;;  %v2720_v4 = vld [vmem:[#allocation2 + $0x24] ss:$16 sps:$4 sm:$0xff]   ;;  %1360 = vmatpush1.bf16.msra.mxu1 %v2718_v2  ;;  %v2724_v6 = vld [vmem:[#allocation2 + $0x20] ss:$16 sps:$4 sm:$0xff]   ;;  %v77_v39 = vunpack.c.l.s4 %v3210_v38  ;;  %v3279_v46 = vshrl.u32 %v79_v40, 7  ;;  %vm1355_vm0 = vcmask 130048  }
  0x2a   :  { %1401 = vmatpush1.bf16.msra.mxu0 %v2719_v3  ;;  %v2722_v5 = vld [vmem:[#allocation2 + $0x224] ss:$16 sps:$4 sm:$0xff]   ;;  %1361 = vmatprep.subr.bf16.mxu1 %v2720_v4  ;;  %v2725_v7 = vld [vmem:[#allocation2 + $0x220] ss:$16 sps:$4 sm:$0xff]   ;;  %v2812_v57 = vld [vmem:[%s3437_s0 + $0x1c] ss:$14 sps:$4 sm:$0xff]  }
  0x2b   :  { %1402 = vmatprep.subr.bf16.mxu0 %v2722_v5  ;;  %v2726_v8 = vld [vmem:[#allocation2 + $0x44] ss:$16 sps:$4 sm:$0xff]   ;;  %v2730_v10 = vld [vmem:[#allocation2 + $0x40] ss:$16 sps:$4 sm:$0xff]   ;;  %v78_v45 = vunpack.c.0.s8 %v77_v39  ;;  %v2845_v39 = vld [vmem:[#allocation2 + $0x8c] ss:$16 sps:$4 sm:$0xff]  }
  0x2c   :  { %v2728_v9 = vld [vmem:[#allocation2 + $0x244] ss:$16 sps:$4 sm:$0xff]   ;;  %v2731_v11 = vld [vmem:[#allocation2 + $0x240] ss:$16 sps:$4 sm:$0xff]   ;;  %vm2352_vm1 = vcmask 80896  }
  0x2d   :  { %1362 = vmatpush1.bf16.msra.mxu1 %v2724_v6  ;;  %v2732_v12 = vld [vmem:[#allocation2 + $0x64] ss:$16 sps:$4 sm:$0xff]   ;;  %v2736_v14 = vld [vmem:[#allocation2 + $0x60] ss:$16 sps:$4 sm:$0xff]   ;;  %v3282_v53 = vsub.s32 %v78_v45, %v3279_v46  ;;  %v2849_v45 = vld [vmem:[#allocation2 + $0xa8] ss:$16 sps:$4 sm:$0xff]  }
  0x2e   :  { %1403 = vmatpush1.bf16.msra.mxu0 %v2725_v7  ;;  %1363 = vmatprep.subr.bf16.mxu1 %v2726_v8  ;;  %v2734_v13 = vld [vmem:[#allocation2 + $0x264] ss:$16 sps:$4 sm:$0xff]   ;;  %v2737_v15 = vld [vmem:[#allocation2 + $0x260] ss:$16 sps:$4 sm:$0xff]  }
  0x2f   :  { %1404 = vmatprep.subr.bf16.mxu0 %v2728_v9  ;;  %v2738_v16 = vld [vmem:[#allocation2 + $0x84] ss:$16 sps:$4 sm:$0xff]   ;;  %v2742_v18 = vld [vmem:[#allocation2 + $0x80] ss:$16 sps:$4 sm:$0xff]   ;;  %v96_v61 = vrot.slane %v2812_v57, %v3282_v53 }
  0x30   :  { %v2740_v17 = vld [vmem:[#allocation2 + $0x284] ss:$16 sps:$4 sm:$0xff]   ;;  %v2743_v19 = vld [vmem:[#allocation2 + $0x280] ss:$16 sps:$4 sm:$0xff]  }
  0x31   :  { %1364 = vmatpush1.bf16.msra.mxu1 %v2730_v10  ;;  %v2744_v20 = vld [vmem:[#allocation2 + $0xa4] ss:$16 sps:$4 sm:$0xff]   ;;  %v2748_v22 = vld [vmem:[#allocation2 + $0xa0] ss:$16 sps:$4 sm:$0xff]  }
  0x32   :  { %1405 = vmatpush1.bf16.msra.mxu0 %v2731_v11  ;;  %1365 = vmatprep.subr.bf16.mxu1 %v2732_v12  ;;  %v2746_v21 = vld [vmem:[#allocation2 + $0x2a4] ss:$16 sps:$4 sm:$0xff]   ;;  %v2749_v23 = vld [vmem:[#allocation2 + $0x2a0] ss:$16 sps:$4 sm:$0xff]  }
  0x33   :  { %1406 = vmatprep.subr.bf16.mxu0 %v2734_v13  ;;  %v2750_v24 = vld [vmem:[#allocation2 + $0xc4] ss:$16 sps:$4 sm:$0xff]   ;;  %v2754_v26 = vld [vmem:[#allocation2 + $0xc0] ss:$16 sps:$4 sm:$0xff]  }
  0x34   :  { %v2752_v25 = vld [vmem:[#allocation2 + $0x2c4] ss:$16 sps:$4 sm:$0xff]   ;;  %v2755_v27 = vld [vmem:[#allocation2 + $0x2c0] ss:$16 sps:$4 sm:$0xff]  }
  0x35   :  { %1366 = vmatpush1.bf16.msra.mxu1 %v2736_v14  ;;  %v2756_v28 = vld [vmem:[#allocation2 + $0xe4] ss:$16 sps:$4 sm:$0xff]   ;;  %v2760_v30 = vld [vmem:[#allocation2 + $0xe0] ss:$16 sps:$4 sm:$0xff]  }
  0x36   :  { %1407 = vmatpush1.bf16.msra.mxu0 %v2737_v15  ;;  %1367 = vmatprep.subr.bf16.mxu1 %v2738_v16  ;;  %v2758_v29 = vld [vmem:[#allocation2 + $0x2e4] ss:$16 sps:$4 sm:$0xff]   ;;  %v2761_v31 = vld [vmem:[#allocation2 + $0x2e0] ss:$16 sps:$4 sm:$0xff]  }
  0x37   :  { %1408 = vmatprep.subr.bf16.mxu0 %v2740_v17  ;;  %v2762_v32 = vld [vmem:[#allocation2 + $0x104] ss:$16 sps:$4 sm:$0xff]   ;;  %v2766_v34 = vld [vmem:[#allocation2 + $0x100] ss:$16 sps:$4 sm:$0xff]  }
  0x38   :  { %v2764_v33 = vld [vmem:[#allocation2 + $0x304] ss:$16 sps:$4 sm:$0xff]   ;;  %v2767_v35 = vld [vmem:[#allocation2 + $0x300] ss:$16 sps:$4 sm:$0xff]  }
  0x39   :  { %1368 = vmatpush1.bf16.msra.mxu1 %v2742_v18  ;;  %v2768_v36 = vld [vmem:[#allocation2 + $0x124] ss:$16 sps:$4 sm:$0xff]   ;;  %v2772_v41 = vld [vmem:[#allocation2 + $0x120] ss:$16 sps:$4 sm:$0xff]  }
  0x3a   :  { %1409 = vmatpush1.bf16.msra.mxu0 %v2743_v19  ;;  %1369 = vmatprep.subr.bf16.mxu1 %v2744_v20  ;;  %v2770_v37 = vld [vmem:[#allocation2 + $0x324] ss:$16 sps:$4 sm:$0xff]   ;;  %v2773_v42 = vld [vmem:[#allocation2 + $0x320] ss:$16 sps:$4 sm:$0xff]  }
  0x3b   :  { %1410 = vmatprep.subr.bf16.mxu0 %v2746_v21  ;;  %v2774_v43 = vld [vmem:[#allocation2 + $0x144] ss:$16 sps:$4 sm:$0xff]   ;;  %v2778_v47 = vld [vmem:[#allocation2 + $0x140] ss:$16 sps:$4 sm:$0xff]   ;;  %v2821_v21 = vld [vmem:[#allocation2 + $0xc] ss:$16 sps:$4 sm:$0xff]  }
  0x3c   :  { %v2776_v44 = vld [vmem:[#allocation2 + $0x344] ss:$16 sps:$4 sm:$0xff]   ;;  %v2779_v48 = vld [vmem:[#allocation2 + $0x340] ss:$16 sps:$4 sm:$0xff]  }
  0x3d   :  { %1370 = vmatpush1.bf16.msra.mxu1 %v2748_v22  ;;  %v2780_v49 = vld [vmem:[#allocation2 + $0x164] ss:$16 sps:$4 sm:$0xff]   ;;  %v2784_v51 = vld [vmem:[#allocation2 + $0x160] ss:$16 sps:$4 sm:$0xff]  }
  0x3e   :  { %1411 = vmatpush1.bf16.msra.mxu0 %v2749_v23  ;;  %1371 = vmatprep.subr.bf16.mxu1 %v2750_v24  ;;  %v2782_v50 = vld [vmem:[#allocation2 + $0x364] ss:$16 sps:$4 sm:$0xff]   ;;  %v2785_v52 = vld [vmem:[#allocation2 + $0x360] ss:$16 sps:$4 sm:$0xff]   ;;  %v2819_v24 = vld [vmem:[#allocation2 + $0x8] ss:$16 sps:$4 sm:$0xff]  }
  0x3f   :  { %1412 = vmatprep.subr.bf16.mxu0 %v2752_v25  ;;  %v2786_v54 = vld [vmem:[#allocation2 + $0x184] ss:$16 sps:$4 sm:$0xff]   ;;  %v2810_v56 = vld [vmem:[%s3437_s0] ss:$14 sps:$4 sm:$0xff]  }
  0x40   :  { %v2788_v55 = vld [vmem:[#allocation2 + $0x384] ss:$16 sps:$4 sm:$0xff]   ;;  %v2815_v59 = vld [vmem:[%s3437_s0 + $0x20] ss:$14 sps:$4 sm:$0xff]   ;;  %v82_v60 = vrot.slane %v2810_v56, %v3282_v53 }
  0x41   :  { %1372 = vmatpush1.bf16.msra.mxu1 %v2754_v26  ;;  %v2814_v58 = vld [vmem:[%s3437_s0 + $0x4] ss:$14 sps:$4 sm:$0xff]   ;;  %v103_v1 = vrot.slane %v2815_v59, %v3282_v53  ;;  %v2861_v59 = vld [vmem:[#allocation2 + $0xe8] ss:$16 sps:$4 sm:$0xff]  }
  0x42   :  { %1413 = vmatpush1.bf16.msra.mxu0 %v2755_v27  ;;  %1373 = vmatprep.subr.bf16.mxu1 %v2756_v28  ;;  %v89_v62 = vrot.slane %v2814_v58, %v3282_v53  ;;  %v2790_v63 = vld [vmem:[#allocation2 + $0x180] ss:$16 sps:$4 sm:$0xff]   ;;  %v2792_v2 = vld [vmem:[#allocation2 + $0x1a4] ss:$16 sps:$4 sm:$0xff]   ;;  %v105_v3 = vcombine.high %v82_v60, %v96_v61  ;;  %v104_v18 = vcombine.low %v82_v60, %v96_v61  ;;  %v2827_v27 = vld [vmem:[#allocation2 + $0x2c] ss:$16 sps:$4 sm:$0xff]  }
  0x43   :  { %1414 = vmatprep.subr.bf16.mxu0 %v2758_v29  ;;  %v2791_v0 = vld [vmem:[#allocation2 + $0x380] ss:$16 sps:$4 sm:$0xff]   ;;  %v2794_v4 = vld [vmem:[#allocation2 + $0x3a4] ss:$16 sps:$4 sm:$0xff]   ;;  %v2825_v29 = vld [vmem:[#allocation2 + $0x28] ss:$16 sps:$4 sm:$0xff]  }
  0x44   :  { %v107_v5 = vcombine.high %v89_v62, %v103_v1  ;;  %v151_v6 = vpack.c.bf16 %v105_v3, %v105_v3  ;;  %v2796_v7 = vld [vmem:[#allocation2 + $0x1a0] ss:$16 sps:$4 sm:$0xff]   ;;  %v2798_v10 = vld [vmem:[#allocation2 + $0x1c4] ss:$16 sps:$4 sm:$0xff]   ;;  %v106_v19 = vcombine.low %v89_v62, %v103_v1  ;;  %v3303_v22 = vpack.c.bf16 %v104_v18, %v104_v18  ;;  %v2869_v61 = vld [vmem:[#allocation2 + $0x10c] ss:$16 sps:$4 sm:$0xff]  }
  0x45   :  { %1374 = vmatpush1.bf16.msra.mxu1 %v2760_v30  ;;  %v2797_v8 = vld [vmem:[#allocation2 + $0x3a0] ss:$16 sps:$4 sm:$0xff]   ;;  %v2800_v11 = vld [vmem:[#allocation2 + $0x3c4] ss:$16 sps:$4 sm:$0xff]   ;;  %v2867_v1 = vld [vmem:[#allocation2 + $0x108] ss:$16 sps:$4 sm:$0xff]  }
  0x46   :  { %1415 = vmatpush1.bf16.msra.mxu0 %v2761_v31  ;;  %1375 = vmatprep.subr.bf16.mxu1 %v2762_v32  ;;  %v3300_v9 = vpack.c.bf16 %v107_v5, %v107_v5  ;;  %v2802_v12 = vld [vmem:[#allocation2 + $0x1c0] ss:$16 sps:$4 sm:$0xff]   ;;  %v2804_v14 = vld [vmem:[#allocation2 + $0x1e4] ss:$16 sps:$4 sm:$0xff]   ;;  %v3305_v25 = vpack.c.bf16 %v106_v19, %v106_v19  ;;  %v2833_v31 = vld [vmem:[#allocation2 + $0x4c] ss:$16 sps:$4 sm:$0xff]  }
  0x47   :  { %1416 = vmatprep.subr.bf16.mxu0 %v2764_v33  ;;  %1391 = vmatprep.mubr.bf16.mxu1 %v151_v6  ;;  %v2803_v13 = vld [vmem:[#allocation2 + $0x3c0] ss:$16 sps:$4 sm:$0xff]   ;;  %v2806_v15 = vld [vmem:[#allocation2 + $0x3e4] ss:$16 sps:$4 sm:$0xff]   ;;  %v2831_v33 = vld [vmem:[#allocation2 + $0x48] ss:$16 sps:$4 sm:$0xff]  }
  0x48   :  { %1432 = vmatprep.mubr.bf16.mxu0 %v3300_v9  ;;  %v2808_v16 = vld [vmem:[#allocation2 + $0x1e0] ss:$16 sps:$4 sm:$0xff]   ;;  %v2818_v20 = vld [vmem:[#allocation2 + $0x404] ss:$16 sps:$4 sm:$0xff]   ;;  %v2875_v3 = vld [vmem:[#allocation2 + $0x12c] ss:$16 sps:$4 sm:$0xff]  }
  0x49   :  { %1376 = vmatpush1.bf16.msra.mxu1 %v2766_v34  ;;  %v2809_v17 = vld [vmem:[#allocation2 + $0x3e0] ss:$16 sps:$4 sm:$0xff]   ;;  %v2824_v26 = vld [vmem:[#allocation2 + $0x424] ss:$16 sps:$4 sm:$0xff]   ;;  %v2873_v5 = vld [vmem:[#allocation2 + $0x128] ss:$16 sps:$4 sm:$0xff]  }
  0x4a   :  { %1417 = vmatpush1.bf16.msra.mxu0 %v2767_v35  ;;  %1377 = vmatprep.subr.bf16.mxu1 %v2768_v36  ;;  %v2816_v23 = vld [vmem:[#allocation2 + $0x400] ss:$16 sps:$4 sm:$0xff]   ;;  %v2830_v30 = vld [vmem:[#allocation2 + $0x444] ss:$16 sps:$4 sm:$0xff]   ;;  %v2839_v35 = vld [vmem:[#allocation2 + $0x6c] ss:$16 sps:$4 sm:$0xff]  }
  0x4b   :  { %1418 = vmatprep.subr.bf16.mxu0 %v2770_v37  ;;  %v2822_v28 = vld [vmem:[#allocation2 + $0x420] ss:$16 sps:$4 sm:$0xff]   ;;  %v2836_v34 = vld [vmem:[#allocation2 + $0x464] ss:$16 sps:$4 sm:$0xff]   ;;  %v2837_v37 = vld [vmem:[#allocation2 + $0x68] ss:$16 sps:$4 sm:$0xff]  }
  0x4c   :  { %v2828_v32 = vld [vmem:[#allocation2 + $0x440] ss:$16 sps:$4 sm:$0xff]   ;;  %v2842_v38 = vld [vmem:[#allocation2 + $0x484] ss:$16 sps:$4 sm:$0xff]   ;;  %v2891_v18 = vld [vmem:[#allocation2 + $0x188] ss:$16 sps:$4 sm:$0xff]  }
  0x4d   :  { %1378 = vmatpush1.bf16.msra.mxu1 %v2772_v41  ;;  %v2834_v36 = vld [vmem:[#allocation2 + $0x460] ss:$16 sps:$4 sm:$0xff]   ;;  %v2843_v41 = vld [vmem:[#allocation2 + $0x88] ss:$16 sps:$4 sm:$0xff]   ;;  %v2866_v60 = vld [vmem:[#allocation2 + $0x504] ss:$16 sps:$4 sm:$0xff]  }
  0x4e   :  { %1419 = vmatpush1.bf16.msra.mxu0 %v2773_v42  ;;  %1379 = vmatprep.subr.bf16.mxu1 %v2774_v43  ;;  %v2840_v40 = vld [vmem:[#allocation2 + $0x480] ss:$16 sps:$4 sm:$0xff]   ;;  %v2848_v42 = vld [vmem:[#allocation2 + $0x4a4] ss:$16 sps:$4 sm:$0xff]   ;;  %v2851_v43 = vld [vmem:[#allocation2 + $0xac] ss:$16 sps:$4 sm:$0xff]  }
  0x4f   :  { %1420 = vmatprep.subr.bf16.mxu0 %v2776_v44  ;;  %v2846_v44 = vld [vmem:[#allocation2 + $0x4a0] ss:$16 sps:$4 sm:$0xff]   ;;  %v2896_v19 = vld [vmem:[#allocation2 + $0x5a4] ss:$16 sps:$4 sm:$0xff]  }
  0x50   :  { %v2858_v56 = vld [vmem:[#allocation2 + $0x4e0] ss:$16 sps:$4 sm:$0xff]  }
  0x51   :  { %1380 = vmatpush1.bf16.msra.mxu1 %v2778_v47  ;;  %v2854_v47 = vld [vmem:[#allocation2 + $0x4c4] ss:$16 sps:$4 sm:$0xff]  }
  0x52   :  { %1421 = vmatpush1.bf16.msra.mxu0 %v2779_v48  ;;  %1381 = vmatprep.subr.bf16.mxu1 %v2780_v49  ;;  %v2857_v48 = vld [vmem:[#allocation2 + $0xcc] ss:$16 sps:$4 sm:$0xff]   ;;  %v2852_v49 = vld [vmem:[#allocation2 + $0x4c0] ss:$16 sps:$4 sm:$0xff]  }
  0x53   :  { %1422 = vmatprep.subr.bf16.mxu0 %v2782_v50  ;;  %v2855_v50 = vld [vmem:[#allocation2 + $0xc8] ss:$16 sps:$4 sm:$0xff]  }
  0x55   :  { %1382 = vmatpush1.bf16.msra.mxu1 %v2784_v51  ;;  %v2860_v51 = vld [vmem:[#allocation2 + $0x4e4] ss:$16 sps:$4 sm:$0xff]  }
  0x56   :  { %1423 = vmatpush1.bf16.msra.mxu0 %v2785_v52  ;;  %1383 = vmatprep.subr.bf16.mxu1 %v2786_v54  ;;  %v2863_v52 = vld [vmem:[#allocation2 + $0xec] ss:$16 sps:$4 sm:$0xff]   ;;  %v2912_v54 = vld [vmem:[%s3437_s0 + $0x8] ss:$14 sps:$4 sm:$0xff]  }
  0x57   :  { %1424 = vmatprep.subr.bf16.mxu0 %v2788_v55  ;;  %v2915_v55 = vld [vmem:[%s3437_s0 + $0x24] ss:$14 sps:$4 sm:$0xff]   ;;  %v3316_v57 = vrot.slane %v2912_v54, %v3282_v53 }
  0x58   :  { %v3319_v58 = vrot.slane %v2915_v55, %v3282_v53  ;;  %v2933_v55 = vld [vmem:[#allocation2 + $0x288] ss:$16 sps:$4 sm:$0xff]  }
  0x59   :  { %1384 = vmatpush1.bf16.msra.mxu1 %v2790_v63  ;;  %v2864_v63 = vld [vmem:[#allocation2 + $0x500] ss:$16 sps:$4 sm:$0xff]  }
  0x5a   :  { %1425 = vmatpush1.bf16.msra.mxu0 %v2791_v0  ;;  %1385 = vmatprep.subr.bf16.mxu1 %v2792_v2  ;;  %v141_v62 = vcombine.high %v3316_v57, %v3319_v58  ;;  %v2872_v2 = vld [vmem:[#allocation2 + $0x524] ss:$16 sps:$4 sm:$0xff]  }
  0x5b   :  { %1426 = vmatprep.subr.bf16.mxu0 %v2794_v4  ;;  %v2870_v4 = vld [vmem:[#allocation2 + $0x520] ss:$16 sps:$4 sm:$0xff]  }
  0x5c   :  { %v3323_v0 = vpack.c.bf16 %v141_v62, %v141_v62  ;;  %v3025_v62 = vld [vmem:[#allocation5 + $0x14] ss:$8 sps:$4 sm:$0xff]  }
  0x5d   :  { %1386 = vmatpush1.bf16.msra.mxu1 %v2796_v7  ;;  %v2881_v7 = vld [vmem:[#allocation2 + $0x14c] ss:$16 sps:$4 sm:$0xff]  }
  0x5e   :  { %1427 = vmatpush1.bf16.msra.mxu0 %v2797_v8  ;;  %1387 = vmatprep.subr.bf16.mxu1 %v2798_v10  ;;  %v2876_v8 = vld [vmem:[#allocation2 + $0x540] ss:$16 sps:$4 sm:$0xff]   ;;  %v2879_v10 = vld [vmem:[#allocation2 + $0x148] ss:$16 sps:$4 sm:$0xff]  }
  0x5f   :  { %1428 = vmatprep.subr.bf16.mxu0 %v2800_v11  ;;  %v2884_v11 = vld [vmem:[#allocation2 + $0x564] ss:$16 sps:$4 sm:$0xff]  }
  0x61   :  { %1388 = vmatpush1.bf16.msra.mxu1 %v2802_v12  ;;  %v2887_v12 = vld [vmem:[#allocation2 + $0x16c] ss:$16 sps:$4 sm:$0xff]  }
  0x62   :  { %1429 = vmatpush1.bf16.msra.mxu0 %v2803_v13  ;;  %1389 = vmatprep.subr.bf16.mxu1 %v2804_v14  ;;  %v2882_v13 = vld [vmem:[#allocation2 + $0x560] ss:$16 sps:$4 sm:$0xff]   ;;  %v2885_v14 = vld [vmem:[#allocation2 + $0x168] ss:$16 sps:$4 sm:$0xff]  }
  0x63   :  { %1430 = vmatprep.subr.bf16.mxu0 %v2806_v15  ;;  %v2890_v15 = vld [vmem:[#allocation2 + $0x584] ss:$16 sps:$4 sm:$0xff]  }
  0x65   :  { %1390 = vmatpush1.bf16.msra.mxu1 %v2808_v16  ;;  %v2893_v16 = vld [vmem:[#allocation2 + $0x18c] ss:$16 sps:$4 sm:$0xff]  }
  0x66   :  { %1431 = vmatpush1.bf16.msra.mxu0 %v2809_v17  ;;  %1523 = vmatprep.subr.bf16.mxu1 %v2821_v21  ;;  %v2888_v17 = vld [vmem:[#allocation2 + $0x580] ss:$16 sps:$4 sm:$0xff]  }
  0x67   :  { %1441 = vmatprep.subr.bf16.mxu0 %v2818_v20  ;;  %v2899_v20 = vld [vmem:[#allocation2 + $0x1ac] ss:$16 sps:$4 sm:$0xff]   ;;  %v2894_v21 = vld [vmem:[#allocation2 + $0x5a0] ss:$16 sps:$4 sm:$0xff]  }
  0x68   :  { %1392 = vmatmul.mubr.bf16.vlgmr.msra.gmra.mrb[0].mxu1 %v3303_v22 }
  0x69   :  { %1433 = vmatmul.mubr.bf16.vlgmr.msra.gmra.mrb[0].mxu0 %v3305_v25  ;;  %1524 = vmatpush1.bf16.msra.mxu1 %v2819_v24  ;;  %v2902_v24 = vld [vmem:[#allocation2 + $0x5c4] ss:$16 sps:$4 sm:$0xff]  }
  0x6a   :  { %1442 = vmatpush1.bf16.msra.mxu0 %v2816_v23  ;;  %1525 = vmatprep.subr.bf16.mxu1 %v2827_v27  ;;  %v2897_v23 = vld [vmem:[#allocation2 + $0x1a8] ss:$16 sps:$4 sm:$0xff]   ;;  %v2900_v27 = vld [vmem:[#allocation2 + $0x5c0] ss:$16 sps:$4 sm:$0xff]  }
  0x6b   :  { %1443 = vmatprep.subr.bf16.mxu0 %v2824_v26  ;;  %1555 = vmatprep.mubr.bf16.mxu1 %v151_v6  ;;  %v2878_v6 = vld [vmem:[#allocation2 + $0x544] ss:$16 sps:$4 sm:$0xff]   ;;  %v2905_v26 = vld [vmem:[#allocation2 + $0x1cc] ss:$16 sps:$4 sm:$0xff]  }
  0x6c   :  { %1473 = vmatprep.mubr.bf16.mxu0 %v3323_v0 }
  0x6d   :  { %1526 = vmatpush1.bf16.msra.mxu1 %v2825_v29  ;;  %v2908_v29 = vld [vmem:[#allocation2 + $0x5e4] ss:$16 sps:$4 sm:$0xff]  }
  0x6e   :  { %1444 = vmatpush1.bf16.msra.mxu0 %v2822_v28  ;;  %1527 = vmatprep.subr.bf16.mxu1 %v2833_v31  ;;  %v2903_v28 = vld [vmem:[#allocation2 + $0x1c8] ss:$16 sps:$4 sm:$0xff]   ;;  %v2906_v31 = vld [vmem:[#allocation2 + $0x5e0] ss:$16 sps:$4 sm:$0xff]  }
  0x6f   :  { %1445 = vmatprep.subr.bf16.mxu0 %v2830_v30  ;;  %v2911_v30 = vld [vmem:[#allocation2 + $0x1ec] ss:$16 sps:$4 sm:$0xff]  }
  0x71   :  { %1528 = vmatpush1.bf16.msra.mxu1 %v2831_v33  ;;  %v2909_v33 = vld [vmem:[#allocation2 + $0x1e8] ss:$16 sps:$4 sm:$0xff]  }
  0x72   :  { %1446 = vmatpush1.bf16.msra.mxu0 %v2828_v32  ;;  %1529 = vmatprep.subr.bf16.mxu1 %v2839_v35  ;;  %v140_v32 = vcombine.low %v3316_v57, %v3319_v58  ;;  %v2920_v35 = vld [vmem:[#allocation2 + $0x20c] ss:$16 sps:$4 sm:$0xff]   ;;  %v2939_v58 = vld [vmem:[#allocation2 + $0x2c8] ss:$16 sps:$4 sm:$0xff]  }
  0x73   :  { %1447 = vmatprep.subr.bf16.mxu0 %v2836_v34  ;;  %v2914_v34 = vld [vmem:[%s3437_s0 + $0xc] ss:$14 sps:$4 sm:$0x33]  }
  0x74   :  { %v2941_v57 = vld [vmem:[#allocation2 + $0x2cc] ss:$16 sps:$4 sm:$0xff]  }
  0x75   :  { %1530 = vmatpush1.bf16.msra.mxu1 %v2837_v37  ;;  %v2917_v37 = vld [vmem:[%s3437_s0 + $0x28] ss:$14 sps:$4 sm:$0x33]  }
  0x76   :  { %1448 = vmatpush1.bf16.msra.mxu0 %v2834_v36  ;;  %1531 = vmatprep.subr.bf16.mxu1 %v2845_v39  ;;  %v2926_v36 = vld [vmem:[#allocation2 + $0x604] ss:$16 sps:$4 sm:$0xff]   ;;  %v2918_v39 = vld [vmem:[#allocation2 + $0x208] ss:$16 sps:$4 sm:$0xff]  }
  0x77   :  { %1449 = vmatprep.subr.bf16.mxu0 %v2842_v38  ;;  %v3334_v38 = vpack.c.bf16 %v140_v32, %v140_v32  ;;  %v3044_v32 = vld [vmem:[#allocation5 + $0x80] ss:$8 sps:$4 sm:$0xff]  }
  0x79   :  { %1532 = vmatpush1.bf16.msra.mxu1 %v2843_v41  ;;  %v2923_v41 = vld [vmem:[#allocation2 + $0x22c] ss:$16 sps:$4 sm:$0xff]  }
  0x7a   :  { %1450 = vmatpush1.bf16.msra.mxu0 %v2840_v40  ;;  %1533 = vmatprep.subr.bf16.mxu1 %v2851_v43  ;;  %v2924_v40 = vld [vmem:[#allocation2 + $0x600] ss:$16 sps:$4 sm:$0xff]   ;;  %v139_v43 = vrot.slane %v2917_v37, %v3282_v53  ;;  %v2971_v37 = vld [vmem:[#allocation2 + $0x40c] ss:$16 sps:$4 sm:$0xff]  }
  0x7b   :  { %1451 = vmatprep.subr.bf16.mxu0 %v2848_v42  ;;  %v125_v42 = vrot.slane %v2914_v34, %v3282_v53  ;;  %v2930_v53 = vld [vmem:[#allocation2 + $0x268] ss:$16 sps:$4 sm:$0xff]   ;;  %v3049_v34 = vld [vmem:[#allocation5 + $0x94] ss:$8 sps:$4 sm:$0xff]  }
  0x7d   :  { %1534 = vmatpush1.bf16.msra.mxu1 %v2849_v45  ;;  %v2929_v45 = vld [vmem:[#allocation2 + $0x24c] ss:$16 sps:$4 sm:$0xff]  }
  0x7e   :  { %1452 = vmatpush1.bf16.msra.mxu0 %v2846_v44  ;;  %1535 = vmatprep.subr.bf16.mxu1 %v2857_v48  ;;  %v2921_v44 = vld [vmem:[#allocation2 + $0x228] ss:$16 sps:$4 sm:$0xff]   ;;  %v3016_v48 = vld [vmem:[#allocation2 + $0x60c] ss:$16 sps:$4 sm:$0xff]  }
  0x7f   :  { %1453 = vmatprep.subr.bf16.mxu0 %v2854_v47  ;;  %v3211_v47 = vmov 0  }
  0x81   :  { %1536 = vmatpush1.bf16.msra.mxu1 %v2855_v50  ;;  %v2927_v50 = vld [vmem:[#allocation2 + $0x248] ss:$16 sps:$4 sm:$0xff]  }
  0x82   :  { %1454 = vmatpush1.bf16.msra.mxu0 %v2852_v49  ;;  %1537 = vmatprep.subr.bf16.mxu1 %v2863_v52  ;;  %v142_v49 = vcombine.low %v125_v42, %v139_v43  ;;  %v3014_v52 = vld [vmem:[#allocation2 + $0x608] ss:$16 sps:$4 sm:$0xff]   ;;  %v3055_v43 = vld [vmem:[#allocation5 + $0xb4] ss:$8 sps:$4 sm:$0xff]  }
  0x83   :  { %1455 = vmatprep.subr.bf16.mxu0 %v2860_v51  ;;  %v2932_v51 = vld [vmem:[#allocation2 + $0x26c] ss:$16 sps:$4 sm:$0xff]   ;;  %v3050_v42 = vld [vmem:[#allocation5 + $0xa0] ss:$8 sps:$4 sm:$0xff]  }
  0x84   :  { %v156_v54 = vpack.c.bf16 %v142_v49, %v142_v49  ;;  %v2975_v49 = vld [vmem:[#allocation2 + $0x448] ss:$16 sps:$4 sm:$0xff]  }
  0x85   :  { %1538 = vmatpush1.bf16.msra.mxu1 %v2861_v59  ;;  %v2944_v59 = vld [vmem:[#allocation2 + $0x2ec] ss:$16 sps:$4 sm:$0xff]  }
  0x86   :  { %1456 = vmatpush1.bf16.msra.mxu0 %v2858_v56  ;;  %1539 = vmatprep.subr.bf16.mxu1 %v2869_v61  ;;  %v2938_v56 = vld [vmem:[#allocation2 + $0x2ac] ss:$16 sps:$4 sm:$0xff]  }
  0x87   :  { %1457 = vmatprep.subr.bf16.mxu0 %v2866_v60  ;;  %v3020_v60 = vld [vmem:[#allocation5] ss:$8 sps:$4 sm:$0xff]   ;;  %v3022_v61 = vld [vmem:[#allocation5 + $0x4] ss:$8 sps:$4 sm:$0xff]  }
  0x89   :  { %1540 = vmatpush1.bf16.msra.mxu1 %v2867_v1  ;;  %v3023_v1 = vld [vmem:[#allocation5 + $0x10] ss:$8 sps:$4 sm:$0xff]  }
  0x8a   :  { %1458 = vmatpush1.bf16.msra.mxu0 %v2864_v63  ;;  %1541 = vmatprep.subr.bf16.mxu1 %v2875_v3  ;;  %v2942_v63 = vld [vmem:[#allocation2 + $0x2e8] ss:$16 sps:$4 sm:$0xff]   ;;  %v3028_v3 = vld [vmem:[#allocation5 + $0x24] ss:$8 sps:$4 sm:$0xff]  }
  0x8b   :  { %1459 = vmatprep.subr.bf16.mxu0 %v2872_v2  ;;  %v2947_v2 = vld [vmem:[#allocation2 + $0x30c] ss:$16 sps:$4 sm:$0xff]  }
  0x8d   :  { %1542 = vmatpush1.bf16.msra.mxu1 %v2873_v5  ;;  %v3026_v5 = vld [vmem:[#allocation5 + $0x20] ss:$8 sps:$4 sm:$0xff]  }
  0x8e   :  { %1460 = vmatpush1.bf16.msra.mxu0 %v2870_v4  ;;  %1543 = vmatprep.subr.bf16.mxu1 %v2881_v7  ;;  %v2945_v4 = vld [vmem:[#allocation2 + $0x308] ss:$16 sps:$4 sm:$0xff]   ;;  %v3031_v7 = vld [vmem:[#allocation5 + $0x34] ss:$8 sps:$4 sm:$0xff]  }
  0x8f   :  { %1461 = vmatprep.subr.bf16.mxu0 %v2878_v6  ;;  %v2950_v6 = vld [vmem:[#allocation2 + $0x32c] ss:$16 sps:$4 sm:$0xff]  }
  0x91   :  { %1544 = vmatpush1.bf16.msra.mxu1 %v2879_v10  ;;  %v3029_v10 = vld [vmem:[#allocation5 + $0x30] ss:$8 sps:$4 sm:$0xff]  }
  0x92   :  { %1462 = vmatpush1.bf16.msra.mxu0 %v2876_v8  ;;  %1545 = vmatprep.subr.bf16.mxu1 %v2887_v12  ;;  %v2948_v8 = vld [vmem:[#allocation2 + $0x328] ss:$16 sps:$4 sm:$0xff]   ;;  %v3034_v12 = vld [vmem:[#allocation5 + $0x44] ss:$8 sps:$4 sm:$0xff]  }
  0x93   :  { %1463 = vmatprep.subr.bf16.mxu0 %v2884_v11  ;;  %v2953_v11 = vld [vmem:[#allocation2 + $0x34c] ss:$16 sps:$4 sm:$0xff]  }
  0x95   :  { %1546 = vmatpush1.bf16.msra.mxu1 %v2885_v14  ;;  %v3032_v14 = vld [vmem:[#allocation5 + $0x40] ss:$8 sps:$4 sm:$0xff]  }
  0x96   :  { %1464 = vmatpush1.bf16.msra.mxu0 %v2882_v13  ;;  %1547 = vmatprep.subr.bf16.mxu1 %v2893_v16  ;;  %v2951_v13 = vld [vmem:[#allocation2 + $0x348] ss:$16 sps:$4 sm:$0xff]   ;;  %v3037_v16 = vld [vmem:[#allocation5 + $0x54] ss:$8 sps:$4 sm:$0xff]  }
  0x97   :  { %1465 = vmatprep.subr.bf16.mxu0 %v2890_v15  ;;  %v2956_v15 = vld [vmem:[#allocation2 + $0x36c] ss:$16 sps:$4 sm:$0xff]  }
  0x99   :  { %1548 = vmatpush1.bf16.msra.mxu1 %v2891_v18  ;;  %v3035_v18 = vld [vmem:[#allocation5 + $0x50] ss:$8 sps:$4 sm:$0xff]  }
  0x9a   :  { %1466 = vmatpush1.bf16.msra.mxu0 %v2888_v17  ;;  %1549 = vmatprep.subr.bf16.mxu1 %v2899_v20  ;;  %v2954_v17 = vld [vmem:[#allocation2 + $0x368] ss:$16 sps:$4 sm:$0xff]   ;;  %v3040_v20 = vld [vmem:[#allocation5 + $0x64] ss:$8 sps:$4 sm:$0xff]  }
  0x9b   :  { %1467 = vmatprep.subr.bf16.mxu0 %v2896_v19  ;;  %v2959_v19 = vld [vmem:[#allocation2 + $0x38c] ss:$16 sps:$4 sm:$0xff]  }
  0x9d   :  { %1550 = vmatpush1.bf16.msra.mxu1 %v2897_v23  ;;  %v3038_v23 = vld [vmem:[#allocation5 + $0x60] ss:$8 sps:$4 sm:$0xff]  }
  0x9e   :  { %1468 = vmatpush1.bf16.msra.mxu0 %v2894_v21  ;;  %1551 = vmatprep.subr.bf16.mxu1 %v2905_v26  ;;  %v2957_v21 = vld [vmem:[#allocation2 + $0x388] ss:$16 sps:$4 sm:$0xff]   ;;  %v3043_v26 = vld [vmem:[#allocation5 + $0x74] ss:$8 sps:$4 sm:$0xff]  }
  0x9f   :  { %1469 = vmatprep.subr.bf16.mxu0 %v2902_v24  ;;  %v2962_v24 = vld [vmem:[#allocation2 + $0x3ac] ss:$16 sps:$4 sm:$0xff]  }
  0xa1   :  { %1552 = vmatpush1.bf16.msra.mxu1 %v2903_v28  ;;  %v3041_v28 = vld [vmem:[#allocation5 + $0x70] ss:$8 sps:$4 sm:$0xff]  }
  0xa2   :  { %1470 = vmatpush1.bf16.msra.mxu0 %v2900_v27  ;;  %1553 = vmatprep.subr.bf16.mxu1 %v2911_v30  ;;  %v2960_v27 = vld [vmem:[#allocation2 + $0x3a8] ss:$16 sps:$4 sm:$0xff]   ;;  %v3046_v30 = vld [vmem:[#allocation5 + $0x84] ss:$8 sps:$4 sm:$0xff]  }
  0xa3   :  { %1471 = vmatprep.subr.bf16.mxu0 %v2908_v29  ;;  %v2965_v29 = vld [vmem:[#allocation2 + $0x3cc] ss:$16 sps:$4 sm:$0xff]  }
  0xa5   :  { %1554 = vmatpush1.bf16.msra.mxu1 %v2909_v33  ;;  %v2968_v33 = vld [vmem:[#allocation2 + $0x3ec] ss:$16 sps:$4 sm:$0xff]  }
  0xa6   :  { %1472 = vmatpush1.bf16.msra.mxu0 %v2906_v31  ;;  %1564 = vmatprep.subr.bf16.mxu1 %v2920_v35  ;;  %v2963_v31 = vld [vmem:[#allocation2 + $0x3c8] ss:$16 sps:$4 sm:$0xff]  }
  0xa7   :  { %1482 = vmatprep.subr.bf16.mxu0 %v2926_v36  ;;  %v2966_v35 = vld [vmem:[#allocation2 + $0x3e8] ss:$16 sps:$4 sm:$0xff]  }
  0xa8   :  { %1556 = vmatmul.mubr.bf16.vlgmr.msra.gmra.mrb[4].mxu1 %v3303_v22  ;;  %v2935_v22 = vld [vmem:[#allocation2 + $0x28c] ss:$16 sps:$4 sm:$0xff]   ;;  %v3047_v36 = vld [vmem:[#allocation5 + $0x90] ss:$8 sps:$4 sm:$0xff]  }
  0xa9   :  { %1474 = vmatmul.mubr.bf16.vlgmr.msra.gmra.mrb[0].mxu0 %v3334_v38  ;;  %1565 = vmatpush1.bf16.msra.mxu1 %v2918_v39  ;;  %v3052_v39 = vld [vmem:[#allocation5 + $0xa4] ss:$8 sps:$4 sm:$0xff]  }
  0xaa   :  { %1483 = vmatpush1.bf16.msra.mxu0 %v2924_v40  ;;  %1566 = vmatprep.subr.bf16.mxu1 %v2923_v41  ;;  %v2969_v40 = vld [vmem:[#allocation2 + $0x408] ss:$16 sps:$4 sm:$0xff]   ;;  %v2974_v41 = vld [vmem:[#allocation2 + $0x42c] ss:$16 sps:$4 sm:$0xff]  }
  0xab   :  { %1514 = vmatprep.mubr.bf16.mxu0 %v3211_v47  ;;  %1596 = vmatprep.mubr.bf16.mxu1 %v3300_v9  ;;  %v2936_v9 = vld [vmem:[#allocation2 + $0x2a8] ss:$16 sps:$4 sm:$0xff]  }
  0xac   :  { %1646 = vmatprep.subr.bf16.mxu0 %v3016_v48  ;;  %v3058_v48 = vld [vmem:[#allocation5 + $0xc4] ss:$8 sps:$4 sm:$0xff]  }
  0xad   :  { %1567 = vmatpush1.bf16.msra.mxu1 %v2921_v44  ;;  %v2972_v44 = vld [vmem:[#allocation2 + $0x428] ss:$16 sps:$4 sm:$0xff]  }
  0xae   :  { %1568 = vmatprep.subr.bf16.mxu1 %v2929_v45  ;;  %v2977_v45 = vld [vmem:[#allocation2 + $0x44c] ss:$16 sps:$4 sm:$0xff]  }
  0xb1   :  { %1569 = vmatpush1.bf16.msra.mxu1 %v2927_v50  ;;  %v2980_v50 = vld [vmem:[#allocation2 + $0x46c] ss:$16 sps:$4 sm:$0xff]  }
  0xb2   :  { %1570 = vmatprep.subr.bf16.mxu1 %v2932_v51  ;;  %v3056_v51 = vld [vmem:[#allocation5 + $0xc0] ss:$8 sps:$4 sm:$0xff]  }
  0xb5   :  { %2568 = vmatmul.mubr.msk.bf16.vlgmr.msra.gmra.mrb[0].mxu0 %vm1355_vm0, %v156_v54  ;;  %1571 = vmatpush1.bf16.msra.mxu1 %v2930_v53  ;;  %v3061_v53 = vld [vmem:[#allocation5 + $0xd4] ss:$8 sps:$4 sm:$0xff]  }
  0xb6   :  { %1647 = vmatpush1.bf16.msra.mxu0 %v3014_v52  ;;  %1572 = vmatprep.subr.bf16.mxu1 %v2935_v22  ;;  %v2983_v52 = vld [vmem:[#allocation2 + $0x48c] ss:$16 sps:$4 sm:$0xff]  }
  0xb7   :  { %1678 = vmatprep.mubr.bf16.mxu0 %v3211_v47  ;;  %2091 = vmatprep.subr.bf16.mxu0 %v3022_v61  ;;  %v3053_v47 = vld [vmem:[#allocation5 + $0xb0] ss:$8 sps:$4 sm:$0xff]   ;;  %v2986_v22 = vld [vmem:[#allocation2 + $0x4ac] ss:$16 sps:$4 sm:$0xff]  }
  0xb8   :  { %v2998_v61 = vld [vmem:[#allocation2 + $0x52c] ss:$16 sps:$4 sm:$0xff]  }
  0xb9   :  { %1573 = vmatpush1.bf16.msra.mxu1 %v2933_v55  ;;  %v2984_v55 = vld [vmem:[#allocation2 + $0x4a8] ss:$16 sps:$4 sm:$0xff]  }
  0xba   :  { %1574 = vmatprep.subr.bf16.mxu1 %v2938_v56  ;;  %v2989_v56 = vld [vmem:[#allocation2 + $0x4cc] ss:$16 sps:$4 sm:$0xff]  }
  0xbd   :  { %2569 = vmatmul.mubr.msk.bf16.vlgmr.msra.gmra.mrb[4].mxu0 %vm1355_vm0, %v156_v54  ;;  %1575 = vmatpush1.bf16.msra.mxu1 %v2936_v9  ;;  %v2981_v54 = vld [vmem:[#allocation2 + $0x488] ss:$16 sps:$4 sm:$0xff]  }
  0xbe   :  { %1576 = vmatprep.subr.bf16.mxu1 %v2941_v57  ;;  %2092 = vmatpush1.bf16.msra.mxu0 %v3020_v60  ;;  %v2987_v9 = vld [vmem:[#allocation2 + $0x4c8] ss:$16 sps:$4 sm:$0xff]   ;;  %v2992_v57 = vld [vmem:[#allocation2 + $0x4ec] ss:$16 sps:$4 sm:$0xff]  }
  0xbf   :  { %2093 = vmatprep.subr.bf16.mxu0 %v3025_v62  ;;  %v2993_v60 = vld [vmem:[#allocation2 + $0x508] ss:$16 sps:$4 sm:$0xff]   ;;  %v3064_v62 = vld [vmem:[#allocation5 + $0xe4] ss:$8 sps:$4 sm:$0xff]  }
  0xc1   :  { %1577 = vmatpush1.bf16.msra.mxu1 %v2939_v58  ;;  %v2990_v58 = vld [vmem:[#allocation2 + $0x4e8] ss:$16 sps:$4 sm:$0xff]  }
  0xc2   :  { %1578 = vmatprep.subr.bf16.mxu1 %v2944_v59  ;;  %2094 = vmatpush1.bf16.msra.mxu0 %v3023_v1  ;;  %v2995_v59 = vld [vmem:[#allocation2 + $0x50c] ss:$16 sps:$4 sm:$0xff]   ;;  %v2996_v1 = vld [vmem:[#allocation2 + $0x528] ss:$16 sps:$4 sm:$0xff]  }
  0xc3   :  { %2095 = vmatprep.subr.bf16.mxu0 %v3028_v3  ;;  %v3067_v3 = vld [vmem:[#allocation5 + $0xf4] ss:$8 sps:$4 sm:$0xff]  }
  0xc5   :  { %1579 = vmatpush1.bf16.msra.mxu1 %v2942_v63  ;;  %v3062_v63 = vld [vmem:[#allocation5 + $0xe0] ss:$8 sps:$4 sm:$0xff]  }
  0xc6   :  { %1580 = vmatprep.subr.bf16.mxu1 %v2947_v2  ;;  %2096 = vmatpush1.bf16.msra.mxu0 %v3026_v5  ;;  %v3001_v2 = vld [vmem:[#allocation2 + $0x54c] ss:$16 sps:$4 sm:$0xff]   ;;  %v2999_v5 = vld [vmem:[#allocation2 + $0x548] ss:$16 sps:$4 sm:$0xff]  }
  0xc7   :  { %2097 = vmatprep.subr.bf16.mxu0 %v3031_v7  ;;  %v3070_v7 = vld [vmem:[#allocation5 + $0x104] ss:$8 sps:$4 sm:$0xff]  }
  0xc9   :  { %1581 = vmatpush1.bf16.msra.mxu1 %v2945_v4  ;;  %v3065_v4 = vld [vmem:[#allocation5 + $0xf0] ss:$8 sps:$4 sm:$0xff]  }
  0xca   :  { %1582 = vmatprep.subr.bf16.mxu1 %v2950_v6  ;;  %2098 = vmatpush1.bf16.msra.mxu0 %v3029_v10  ;;  %v3004_v6 = vld [vmem:[#allocation2 + $0x56c] ss:$16 sps:$4 sm:$0xff]  }
  0xcb   :  { %2099 = vmatprep.subr.bf16.mxu0 %v3034_v12  ;;  %v3007_v10 = vld [vmem:[#allocation2 + $0x58c] ss:$16 sps:$4 sm:$0xff]  }
  0xcc   :  { %v3010_v12 = vld [vmem:[#allocation2 + $0x5ac] ss:$16 sps:$4 sm:$0xff]  }
  0xcd   :  { %1583 = vmatpush1.bf16.msra.mxu1 %v2948_v8  ;;  %v3002_v8 = vld [vmem:[#allocation2 + $0x568] ss:$16 sps:$4 sm:$0xff]  }
  0xce   :  { %1584 = vmatprep.subr.bf16.mxu1 %v2953_v11  ;;  %2100 = vmatpush1.bf16.msra.mxu0 %v3032_v14  ;;  %v3005_v11 = vld [vmem:[#allocation2 + $0x588] ss:$16 sps:$4 sm:$0xff]   ;;  %v3013_v14 = vld [vmem:[#allocation2 + $0x5cc] ss:$16 sps:$4 sm:$0xff]  }
  0xcf   :  { %2101 = vmatprep.subr.bf16.mxu0 %v3037_v16  ;;  %v3019_v16 = vld [vmem:[#allocation2 + $0x5ec] ss:$16 sps:$4 sm:$0xff]  }
  0xd1   :  { %1585 = vmatpush1.bf16.msra.mxu1 %v2951_v13  ;;  %v3008_v13 = vld [vmem:[#allocation2 + $0x5a8] ss:$16 sps:$4 sm:$0xff]  }
  0xd2   :  { %1586 = vmatprep.subr.bf16.mxu1 %v2956_v15  ;;  %2102 = vmatpush1.bf16.msra.mxu0 %v3035_v18  ;;  %v3011_v15 = vld [vmem:[#allocation2 + $0x5c8] ss:$16 sps:$4 sm:$0xff]  }
  0xd3   :  { %2103 = vmatprep.subr.bf16.mxu0 %v3040_v20 }
  0xd5   :  { %1587 = vmatpush1.bf16.msra.mxu1 %v2954_v17  ;;  %v3017_v17 = vld [vmem:[#allocation2 + $0x5e8] ss:$16 sps:$4 sm:$0xff]  }
  0xd6   :  { %1588 = vmatprep.subr.bf16.mxu1 %v2959_v19  ;;  %2104 = vmatpush1.bf16.msra.mxu0 %v3038_v23  ;;  %v357_v23 = vsub.s32 0, %v3279_v46 }
  0xd7   :  { %2105 = vmatprep.subr.bf16.mxu0 %v3043_v26  ;;  %v361_v26 = vsub.s32 1, %v3279_v46 }
  0xd9   :  { %1589 = vmatpush1.bf16.msra.mxu1 %v2957_v21 }
  0xda   :  { %1590 = vmatprep.subr.bf16.mxu1 %v2962_v24  ;;  %2106 = vmatpush1.bf16.msra.mxu0 %v3041_v28  ;;  %v3348_v24 = vld [vmem:[%s3439_s2] sm:$0xf] }
  0xdb   :  { %2107 = vmatprep.subr.bf16.mxu0 %v3046_v30  ;;  %v3117_v30 = vld [vmem:[%s3442_s5] sm:$0xff]  }
  0xdd   :  { %1591 = vmatpush1.bf16.msra.mxu1 %v2960_v27  ;;  %v358_v27 = vrot.slane %v3348_v24, %v357_v23 }
  0xde   :  { %1592 = vmatprep.subr.bf16.mxu1 %v2965_v29  ;;  %2108 = vmatpush1.bf16.msra.mxu0 %v3044_v32  ;;  %v3116_v29 = vld [vmem:[%s3442_s5 + $0x40] sm:$0xff]  }
  0xdf   :  { %2109 = vmatprep.subr.bf16.mxu0 %v3049_v34 }
  0xe1   :  { %1593 = vmatpush1.bf16.msra.mxu1 %v2963_v31  ;;  %v3118_v31 = vld [vmem:[%s3442_s5 + $0x48] sm:$0xff]  }
  0xe2   :  { %1594 = vmatprep.subr.bf16.mxu1 %v2968_v33  ;;  %2110 = vmatpush1.bf16.msra.mxu0 %v3047_v36 }
  0xe3   :  { %2111 = vmatprep.subr.bf16.mxu0 %v3052_v39  ;;  %v3119_v39 = vld [vmem:[%s3442_s5 + $0x8] sm:$0xff]  }
  0xe5   :  { %1595 = vmatpush1.bf16.msra.mxu1 %v2966_v35 }
  0xe6   :  { %1605 = vmatprep.subr.bf16.mxu1 %v2971_v37  ;;  %2112 = vmatpush1.bf16.msra.mxu0 %v3050_v42  ;;  %v3120_v42 = vld [vmem:[%s3442_s5 + $0x50] sm:$0xff]  }
  0xe7   :  { %2113 = vmatprep.subr.bf16.mxu0 %v3055_v43 }
  0xe8   :  { %1597 = vmatmul.mubr.bf16.vlgmr.msra.gmra.mrb[4].mxu1 %v3305_v25  ;;  %v2978_v25 = vld [vmem:[#allocation2 + $0x468] ss:$16 sps:$4 sm:$0xff]  }
  0xe9   :  { %1606 = vmatpush1.bf16.msra.mxu1 %v2969_v40  ;;  %1637 = vmatprep.mubr.bf16.mxu1 %v3323_v0  ;;  %v3059_v0 = vld [vmem:[#allocation5 + $0xd0] ss:$8 sps:$4 sm:$0xff]  }
  0xea   :  { %1607 = vmatprep.subr.bf16.mxu1 %v2974_v41  ;;  %2114 = vmatpush1.bf16.msra.mxu0 %v3053_v47  ;;  %v3121_v47 = vld [vmem:[%s3442_s5 + $0x10] sm:$0xff]  }
  0xeb   :  { %2115 = vmatprep.subr.bf16.mxu0 %v3058_v48 }
  0xed   :  { %1608 = vmatpush1.bf16.msra.mxu1 %v2972_v44 }
  0xee   :  { %1609 = vmatprep.subr.bf16.mxu1 %v2977_v45  ;;  %2116 = vmatpush1.bf16.msra.mxu0 %v3056_v51  ;;  %v3068_v45 = vld [vmem:[#allocation5 + $0x100] ss:$8 sps:$4 sm:$0xff]  }
  0xef   :  { %2117 = vmatprep.subr.bf16.mxu0 %v3061_v53 }
  0xf1   :  { %1610 = vmatpush1.bf16.msra.mxu1 %v2975_v49  ;;  %v3073_v49 = vld [vmem:[#allocation5 + $0x114] ss:$8 sps:$4 sm:$0xff]  }
  0xf2   :  { %1611 = vmatprep.subr.bf16.mxu1 %v2980_v50  ;;  %2118 = vmatpush1.bf16.msra.mxu0 %v3059_v0  ;;  %v3122_v50 = vld [vmem:[%s3442_s5 + $0x58] sm:$0xff]  }
  0xf3   :  { %2119 = vmatprep.subr.bf16.mxu0 %v3064_v62  ;;  %v3123_v0 = vld [vmem:[%s3442_s5 + $0x18] sm:$0xff]   ;;  %v3080_v62 = vld [vmem:[#allocation5 + $0x140] ss:$8 sps:$4 sm:$0xff]  }
  0xf5   :  { %1612 = vmatpush1.bf16.msra.mxu1 %v2978_v25  ;;  %v3071_v25 = vld [vmem:[#allocation5 + $0x110] ss:$8 sps:$4 sm:$0xff]  }
  0xf6   :  { %1613 = vmatprep.subr.bf16.mxu1 %v2983_v52  ;;  %2120 = vmatpush1.bf16.msra.mxu0 %v3062_v63  ;;  %v3085_v63 = vld [vmem:[#allocation5 + $0x154] ss:$8 sps:$4 sm:$0xff]  }
  0xf7   :  { %2121 = vmatprep.subr.bf16.mxu0 %v3067_v3  ;;  %v3086_v3 = vld [vmem:[#allocation5 + $0x160] ss:$8 sps:$4 sm:$0xff]  }
  0xf9   :  { %1614 = vmatpush1.bf16.msra.mxu1 %v2981_v54  ;;  %v3076_v54 = vld [vmem:[#allocation5 + $0x124] ss:$8 sps:$4 sm:$0xff]  }
  0xfa   :  { %1615 = vmatprep.subr.bf16.mxu1 %v2986_v22  ;;  %2122 = vmatpush1.bf16.msra.mxu0 %v3065_v4  ;;  %v3091_v4 = vld [vmem:[#allocation5 + $0x174] ss:$8 sps:$4 sm:$0xff]  }
  0xfb   :  { %2132 = vmatprep.subr.bf16.mxu0 %v3070_v7  ;;  %v3092_v7 = vld [vmem:[#allocation5 + $0x180] ss:$8 sps:$4 sm:$0xff]  }
  0xfd   :  { %1616 = vmatpush1.bf16.msra.mxu1 %v2984_v55  ;;  %v3124_v55 = vld [vmem:[%s3442_s5 + $0x60] sm:$0xff]  }
  0xfe   :  { %1617 = vmatprep.subr.bf16.mxu1 %v2989_v56  ;;  %v3074_v56 = vld [vmem:[#allocation5 + $0x120] ss:$8 sps:$4 sm:$0xff]  }
 0x101   :  { %1618 = vmatpush1.bf16.msra.mxu1 %v2987_v9  ;;  %v3125_v9 = vld [vmem:[%s3442_s5 + $0x20] sm:$0xff]  }
 0x102   :  { %1619 = vmatprep.subr.bf16.mxu1 %v2992_v57  ;;  %v3079_v57 = vld [vmem:[#allocation5 + $0x134] ss:$8 sps:$4 sm:$0xff]  }
 0x105   :  { %1620 = vmatpush1.bf16.msra.mxu1 %v2990_v58  ;;  %v3126_v58 = vld [vmem:[%s3442_s5 + $0x68] sm:$0xff]  }
 0x106   :  { %1621 = vmatprep.subr.bf16.mxu1 %v2995_v59  ;;  %v3077_v59 = vld [vmem:[#allocation5 + $0x130] ss:$8 sps:$4 sm:$0xff]  }
 0x109   :  { %1622 = vmatpush1.bf16.msra.mxu1 %v2993_v60  ;;  %v3127_v60 = vld [vmem:[%s3442_s5 + $0x28] sm:$0xff]  }
 0x10a   :  { %1623 = vmatprep.subr.bf16.mxu1 %v2998_v61  ;;  %v3082_v61 = vld [vmem:[#allocation5 + $0x144] ss:$8 sps:$4 sm:$0xff]  }
 0x10d   :  { %1624 = vmatpush1.bf16.msra.mxu1 %v2996_v1  ;;  %v3083_v1 = vld [vmem:[#allocation5 + $0x150] ss:$8 sps:$4 sm:$0xff]  }
 0x10e   :  { %1625 = vmatprep.subr.bf16.mxu1 %v3001_v2  ;;  %v3088_v2 = vld [vmem:[#allocation5 + $0x164] ss:$8 sps:$4 sm:$0xff]  }
 0x111   :  { %1626 = vmatpush1.bf16.msra.mxu1 %v2999_v5  ;;  %v3089_v5 = vld [vmem:[#allocation5 + $0x170] ss:$8 sps:$4 sm:$0xff]  }
 0x112   :  { %1627 = vmatprep.subr.bf16.mxu1 %v3004_v6  ;;  %v3094_v6 = vld [vmem:[#allocation5 + $0x184] ss:$8 sps:$4 sm:$0xff]  }
 0x115   :  { %1628 = vmatpush1.bf16.msra.mxu1 %v3002_v8  ;;  %v3097_v8 = vld [vmem:[#allocation5 + $0x194] ss:$8 sps:$4 sm:$0xff]  }
 0x116   :  { %1629 = vmatprep.subr.bf16.mxu1 %v3007_v10  ;;  %v3095_v10 = vld [vmem:[#allocation5 + $0x190] ss:$8 sps:$4 sm:$0xff]  }
 0x119   :  { %1630 = vmatpush1.bf16.msra.mxu1 %v3005_v11  ;;  %v3100_v11 = vld [vmem:[#allocation5 + $0x1a4] ss:$8 sps:$4 sm:$0xff]  }
 0x11a   :  { %1631 = vmatprep.subr.bf16.mxu1 %v3010_v12  ;;  %v3098_v12 = vld [vmem:[#allocation5 + $0x1a0] ss:$8 sps:$4 sm:$0xff]  }
 0x11d   :  { %1632 = vmatpush1.bf16.msra.mxu1 %v3008_v13  ;;  %v3103_v13 = vld [vmem:[#allocation5 + $0x1b4] ss:$8 sps:$4 sm:$0xff]  }
 0x11e   :  { %1633 = vmatprep.subr.bf16.mxu1 %v3013_v14  ;;  %v3101_v14 = vld [vmem:[#allocation5 + $0x1b0] ss:$8 sps:$4 sm:$0xff]  }
 0x121   :  { %1634 = vmatpush1.bf16.msra.mxu1 %v3011_v15  ;;  %v3106_v15 = vld [vmem:[#allocation5 + $0x1c4] ss:$8 sps:$4 sm:$0xff]  }
 0x122   :  { %1635 = vmatprep.subr.bf16.mxu1 %v3019_v16  ;;  %v3104_v16 = vld [vmem:[#allocation5 + $0x1c0] ss:$8 sps:$4 sm:$0xff]  }
 0x125   :  { %1636 = vmatpush1.bf16.msra.mxu1 %v3017_v17  ;;  %v3109_v17 = vld [vmem:[#allocation5 + $0x1d4] ss:$8 sps:$4 sm:$0xff]  }
 0x126   :  { %2651 = vmatprep.subr.bf16.mxu1 %v3116_v29 }
 0x128   :  { %1638 = vmatmul.mubr.bf16.vlgmr.msra.gmra.mrb[4].mxu1 %v3334_v38  ;;  %v362_v38 = vrot.slane %v3348_v24, %v361_v26 }
 0x129   :  { %2652 = vmatpush3.bf16.msra.mxu1 %v3117_v30 }
 0x12a   :  { %2653 = vmatprep.subr.bf16.mxu1 %v3118_v31 }
 0x12d   :  { %2654 = vmatpush3.bf16.msra.mxu1 %v3119_v39 }
 0x12e   :  { %2655 = vmatprep.subr.bf16.mxu1 %v3120_v42 }
 0x131   :  { %2656 = vmatpush3.bf16.msra.mxu1 %v3121_v47  ;;  %v3131_v47 = vld [vmem:[%s3442_s5 + $0x38] sm:$0xff]  }
 0x132   :  { %2657 = vmatprep.subr.bf16.mxu1 %v3122_v50 }
 0x135   :  { %2658 = vmatpush3.bf16.msra.mxu1 %v3123_v0 }
 0x136   :  { %2659 = vmatprep.subr.bf16.mxu1 %v3124_v55 }
 0x139   :  { %2660 = vmatpush3.bf16.msra.mxu1 %v3125_v9 }
 0x13a   :  { %2661 = vmatprep.subr.bf16.mxu1 %v3126_v58 }
 0x13b   :  { %v1393_v18 = vpop.f32.mrb[0].mxu1 }
 0x13c   :  { %v1395_v19 = vpop.f32.mrb[1].mxu1  ;;  %v1394_v28 = vadd.f32 %v1393_v18, %v358_v27  ;;  %v3107_v18 = vld [vmem:[#allocation5 + $0x1d0] ss:$8 sps:$4 sm:$0xff]  }
 0x13d   :  { %v1397_v20 = vpop.f32.mrb[2].mxu1  ;;  %v1396_v32 = vadd.f32 %v1395_v19, %v362_v38  ;;  %2662 = vmatpush3.bf16.msra.mxu1 %v3127_v60  ;;  %v3112_v19 = vld [vmem:[#allocation5 + $0x1e4] ss:$8 sps:$4 sm:$0xff]   ;;  %v3113_v27 = vld [vmem:[#allocation5 + $0x1f0] ss:$8 sps:$4 sm:$0xff]   ;;  %v365_v38 = vsub.s32 2, %v3279_v46 }
 0x13e   :  { %v1398_v21 = vpop.f32.mrb[3].mxu1  ;;  %v3110_v20 = vld [vmem:[#allocation5 + $0x1e0] ss:$8 sps:$4 sm:$0xff]  }
 0x13f   :  { %v3115_v21 = vld [vmem:[#allocation5 + $0x1f4] ss:$8 sps:$4 sm:$0xff]   ;;  %v366_v29 = vrot.slane %v3348_v24, %v365_v38 }
 0x188   :  { %v1516_v33 = vpop.f32.mrb[0].mxu0 }
 0x189   :  { %v2674_v34 = vadd.f32 %v1516_v33, %v1394_v28  ;;  %v1518_v35 = vpop.f32.mrb[1].mxu0  ;;  %v369_v28 = vsub.s32 3, %v3279_v46 }
 0x18a   :  { %v2676_v36 = vadd.f32 %v1518_v35, %v1396_v32  ;;  %v1520_v37 = vpop.f32.mrb[2].mxu0 }
 0x18b   :  { %v1687_v40 = vmax.f32 %v2674_v34, 0.0  ;;  %v1521_v41 = vpop.f32.mrb[3].mxu0  ;;  %v370_v30 = vrot.slane %v3348_v24, %v369_v28  ;;  %v3128_v24 = vld [vmem:[%s3442_s5 + $0x70] sm:$0xff]  }
 0x18c   :  { %v1688_v43 = vmax.f32 %v2676_v36, 0.0  ;;  %2663 = vmatprep.subr.bf16.mxu1 %v3128_v24 }
 0x18d   :  { %v1691_v48 = vpack.c.bf16 %v1687_v40, %v1687_v40 }
 0x18e   :  { %v1692_v44 = vpack.c.bf16 %v1688_v43, %v1688_v43 }
 0x190   :  { %2123 = vmatprep.mubr.bf16.mxu0 %v1692_v44  ;;  %v3378_v51 = vpop.f32.mrb[4].mxu0  ;;  %v3129_v44 = vld [vmem:[%s3442_s5 + $0x30] sm:$0xff]  }
 0x191   :  { %2124 = vmatmul.mubr.bf16.vlgmr.msra.gmra.mrb[8].mxu0 %v1691_v48  ;;  %v3380_v53 = vpop.f32.mrb[5].mxu0  ;;  %2664 = vmatpush3.bf16.msra.mxu1 %v3129_v44  ;;  %v1759_v48 = vld [vmem:[%s3441_s4] sm:$0x3] }
 0x192   :  { %2133 = vmatpush1.bf16.msra.mxu0 %v3068_v45  ;;  %v1684_v52 = vpop.f32.mrb[6].mxu0  ;;  %v3130_v45 = vld [vmem:[%s3442_s5 + $0x78] sm:$0xff]   ;;  %v1768_v50 = vrot.slane %v1759_v48, %v361_v26 }
 0x193   :  { %2134 = vmatprep.subr.bf16.mxu0 %v3073_v49  ;;  %v1685_v22 = vpop.f32.mrb[7].mxu0  ;;  %2665 = vmatprep.subr.bf16.mxu1 %v3130_v45  ;;  %v1764_v49 = vrot.slane %v1759_v48, %v357_v23  ;;  %v2634_v23 = vld [vmem:[%s3443_s6] ss:$0 sm:$0xff] }
 0x195   :  { %2666 = vmatpush3.bf16.msra.mxu1 %v3131_v47 }
 0x196   :  { %2135 = vmatpush1.bf16.msra.mxu0 %v3071_v25 }
 0x197   :  { %2136 = vmatprep.subr.bf16.mxu0 %v3076_v54 }
 0x19a   :  { %2137 = vmatpush1.bf16.msra.mxu0 %v3074_v56 }
 0x19b   :  { %2138 = vmatprep.subr.bf16.mxu0 %v3079_v57 }
 0x19e   :  { %2139 = vmatpush1.bf16.msra.mxu0 %v3077_v59 }
 0x19f   :  { %2140 = vmatprep.subr.bf16.mxu0 %v3082_v61 }
 0x1a2   :  { %2141 = vmatpush1.bf16.msra.mxu0 %v3080_v62 }
 0x1a3   :  { %2142 = vmatprep.subr.bf16.mxu0 %v3085_v63 }
 0x1a6   :  { %2143 = vmatpush1.bf16.msra.mxu0 %v3083_v1 }
 0x1a7   :  { %2144 = vmatprep.subr.bf16.mxu0 %v3088_v2 }
 0x1aa   :  { %2145 = vmatpush1.bf16.msra.mxu0 %v3086_v3 }
 0x1ab   :  { %2146 = vmatprep.subr.bf16.mxu0 %v3091_v4 }
 0x1ae   :  { %2147 = vmatpush1.bf16.msra.mxu0 %v3089_v5 }
 0x1af   :  { %2148 = vmatprep.subr.bf16.mxu0 %v3094_v6 }
 0x1b2   :  { %2149 = vmatpush1.bf16.msra.mxu0 %v3092_v7 }
 0x1b3   :  { %2150 = vmatprep.subr.bf16.mxu0 %v3097_v8 }
 0x1b6   :  { %2151 = vmatpush1.bf16.msra.mxu0 %v3095_v10 }
 0x1b7   :  { %2152 = vmatprep.subr.bf16.mxu0 %v3100_v11 }
 0x1ba   :  { %2153 = vmatpush1.bf16.msra.mxu0 %v3098_v12 }
 0x1bb   :  { %2154 = vmatprep.subr.bf16.mxu0 %v3103_v13 }
 0x1be   :  { %2155 = vmatpush1.bf16.msra.mxu0 %v3101_v14 }
 0x1bf   :  { %2156 = vmatprep.subr.bf16.mxu0 %v3106_v15 }
 0x1c2   :  { %2157 = vmatpush1.bf16.msra.mxu0 %v3104_v16 }
 0x1c3   :  { %2158 = vmatprep.subr.bf16.mxu0 %v3109_v17 }
 0x1c6   :  { %2159 = vmatpush1.bf16.msra.mxu0 %v3107_v18 }
 0x1c7   :  { %2160 = vmatprep.subr.bf16.mxu0 %v3112_v19 }
 0x1ca   :  { %2161 = vmatpush1.bf16.msra.mxu0 %v3110_v20 }
 0x1cb   :  { %2162 = vmatprep.subr.bf16.mxu0 %v3115_v21 }
 0x1ce   :  { %2163 = vmatpush1.bf16.msra.mxu0 %v3113_v27 }
 0x1fb   :  { %v1639_v31 = vpop.f32.mrb[4].mxu1 }
 0x1fc   :  { %v2677_v32 = vadd.f32 %v1639_v31, %v366_v29  ;;  %v1641_v33 = vpop.f32.mrb[5].mxu1 }
 0x1fd   :  { %v2679_v34 = vadd.f32 %v1641_v33, %v370_v30  ;;  %v1643_v35 = vpop.f32.mrb[6].mxu1 }
 0x1fe   :  { %v2678_v36 = vadd.f32 %v2677_v32, %v3378_v51  ;;  %v1644_v37 = vpop.f32.mrb[7].mxu1 }
 0x1ff   :  { %v2680_v39 = vadd.f32 %v2679_v34, %v3380_v53 }
 0x200   :  { %v1689_v40 = vmax.f32 %v2678_v36, 0.0 }
 0x201   :  { %v1690_v41 = vmax.f32 %v2680_v39, 0.0 }
 0x202   :  { %v1693_v43 = vpack.c.bf16 %v1689_v40, %v1689_v40 }
 0x203   :  { %v1694_v42 = vpack.c.bf16 %v1690_v41, %v1690_v41 }
 0x205   :  { %2164 = vmatprep.mubr.bf16.mxu0 %v1694_v42 }
 0x206   :  { %2165 = vmatmul.mubr.bf16.vlgmr.msra.gmra.mrb[8].mxu0 %v1693_v43 }
 0x2d9   :  { %v2166_v51 = vpop.f32.mrb[8].mxu0 }
 0x2da   :  { %v2681_v53 = vadd.f32 %v2166_v51, %v1764_v49  ;;  %v2168_v25 = vpop.f32.mrb[9].mxu0 }
 0x2db   :  { %v2682_v52 = vadd.f32 %v2168_v25, %v1768_v50  ;;  %v2170_v0 = vpop.f32.mrb[10].mxu0 }
 0x2dc   :  { %v2173_v54 = vmax.f32 %v2681_v53, 0.0  ;;  %v2171_v22 = vpop.f32.mrb[11].mxu0 }
 0x2dd   :  { %v2174_v55 = vmax.f32 %v2682_v52, 0.0 }
 0x2de   :  { %v2175_v9 = vpack.c.bf16 %v2173_v54, %v2173_v54 }
 0x2df   :  { %v2176_v56 = vpack.c.bf16 %v2174_v55, %v2174_v55 }
 0x2e1   :  { %2344 = vmatprep.mubr.bf16.mxu1 %v2176_v56 }
 0x2e2   :  { %2345 = vmatmul.mubr.bf16.vlgmr.msra.gmra.mrb[8].mxu1 %v2175_v9 }
 0x3b5   :  { %v2667_v57 = vpop.f32.mrb[8].mxu1 }
 0x3b6   :  { %v2668_v58 = vpop.f32.mrb[9].mxu1 }
 0x3b7   :  { %v2669_v46 = vadd.f32 %v2668_v58, %v2667_v57  ;;  %v2670_v26 = vpop.f32.mrb[10].mxu1 }
 0x3b8   :  { %v2671_v59 = vpop.f32.mrb[11].mxu1 }
 0x3b9   :  { %v2347_v60 = vadd.f32 %v2669_v46, %v2634_v23 }
 0x3bb   :  { %2353 = vst.msk [vmem:[#allocation7] sm:$0xff] %vm2352_vm1, %v2347_v60 }
 0x3bc   :  { %2358 = vsyncadd [#allocation4], 96  ;;  %s3212_s26 = smov [#allocation7]  }
 0x3bd   :  { %s2359_s27 = sshll.u32 %s3212_s26, 4  ;;  %s2360_s27 = int_to_ptr.vmem [resolvable:$true] %s2359_s27 }
 0x3be   :  { %s3176_s3 = scalar_lea.vmem %s2360_s27, 32  ;;  %s3180_s28 = scalar_lea.vmem %s2360_s27, 128 }
 0x3bf   :  { %p3177_p2 = scmp.ne.s32.totalorder %s2360_s27, %s3176_s3  ;;  %p3181_p3 = scmp.lt.s32.totalorder %s2360_s27, %s2360_s27 }
 0x3c0   :  { %p3182_p4 = scmp.lt.s32.totalorder %s3180_s28, %s3176_s3 }
 0x3c2   :  { %p3183_p5 = por %p3182_p4, %p3181_p3 }
 0x3c4   :  { %p3184_p6 = pnand %p3183_p5, %p3177_p2 }
 0x3c6   :  { %3187 = shalt.err (!%p3184_p6)
}
 0x3c7   :  { %s3188_s30 = scalar_lea.hbm %s3444_s7, 32 }
 0x3c8   :  { %p3189_p7 = scmp.ne.s32.totalorder %s3444_s7, %s3188_s30  ;;  %p3192_p8 = scmp.lt.u32.totalorder %s3188_s30, %s3444_s7 }
 0x3ca   :  { %p3194_p9 = pnand %p3192_p8, %p3189_p7 }
 0x3cc   :  { %3197 = shalt.err (!%p3194_p9)
}
 0x3cd   :  { %s3213_s12 = smov 32   ;;  %s3214_s13 = smov 2  }
 0x3ce   :  { %2365 = dma.vmem_to_hbm [thread:$0]  %s2360_s27, 32, %s3444_s7, [#allocation4], %s3213_s12, %s3213_s12, %s3214_s13  }
 0x3cf   :  { %3202 = dma.done.wait [#allocation4], 128  }
 0x3d0   :  { %3203 = vsyncadd [#allocation4], 4294967168 }
 0x3d1   :  { %2369 = vsyncpa [#allocation3], 1 }
 0x3d2   :  { %2370 = vsyncpa [#allocation6], 1 }
 0x3d3   :  { %2371 = vsyncpa [#allocation4], 1 }

</bundles_post_ra>
